<compile_context>
chip_gen: v7x
topology: tpu7x:2x2x1
jax: 0.10.0
libtpu: 0.0.40
codegen_flags: <defaults>
</compile_context>

<pallas_src>
import functools
import math

import jax
import jax.numpy as jnp
import numpy as np
from jax import lax
from jax.experimental import pallas as pl
from jax.experimental.pallas import tpu as pltpu


def _erf(x):
    # Numerical Recipes 6.2 erfc approximation (|fractional error| < 1.2e-7).
    a = jnp.abs(x)
    t = pl.reciprocal(1.0 + 0.5 * a, approx=False)   # EUP, off the VALU path
    poly = -1.26551223 + t * (1.00002368 + t * (0.37409196 + t * (0.09678418 +
           t * (-0.18628806 + t * (0.27886807 + t * (-1.13520398 + t * (1.48851587 +
           t * (-0.82215223 + t * 0.17087277))))))))
    erfc = t * jnp.exp(-a * a + poly)
    return jnp.where(x >= 0.0, 1.0 - erfc, erfc - 1.0)


def _gelu_exact(x):
    # matches torch.nn.GELU() (approximate='none')
    return 0.5 * x * (1.0 + _erf(x * 0.7071067811865476))


def dgat_kernel(num_heads,
                x_ref, ef_ref, s_ref, d_ref,
                w_in_ref, b_in_ref, w_u_ref, b_u_ref, w_v_ref,
                w_eae_ref, b_eae_ref,
                w1_ref, b1_ref, w2_ref, b2_ref, out_ref):
    f32 = jnp.float32
    dot = lambda a, b: jnp.dot(a, b, preferred_element_type=f32)
    # a^T @ b: contract the shared leading (edge) axis of both operands so the
    # MXU consumes the transposed incidence matrix directly (no D^T input).
    dot_t = lambda a, b: lax.dot_general(
        a, b, (((0,), (0,)), ((), ())), preferred_element_type=f32)

    S = s_ref[...].astype(f32)          # [E, N] one-hot source (bf16 in HBM)
    D = d_ref[...].astype(f32)          # [E, N] one-hot destination

    # --- input projection + (folded) edge attention projection --------------
    x1 = dot(x_ref[...], w_in_ref[...]) + b_in_ref[...]             # [N, dim]
    ae = dot(ef_ref[...], w_eae_ref[...]) + b_eae_ref[...]          # [E, H]

    # --- attention logits ----------------------------------------------------
    au = dot(x1, w_u_ref[...]) + b_u_ref[...]                       # [N, H]
    av = dot(x1, w_v_ref[...])                                      # [N, H] (no bias)
    scores = dot(S, au) + dot(D, av) + ae                           # u_add_v + e  [E, H]
    scores = jnp.where(scores >= 0.0, scores, 0.2 * scores)         # LeakyReLU(0.2)

    # --- edge softmax grouped by destination: lane-dense per-head max -------
    head_iota = lax.broadcasted_iota(jnp.int32, scores.shape, 1)    # [E, H]
    max_e = jnp.zeros_like(scores)
    for h in range(num_heads):                                      # static, H small
        col_h = head_iota == h
        # exact column extraction via masked sum (no lane slicing)
        s_h = jnp.sum(jnp.where(col_h, scores, 0.0), axis=1, keepdims=True)  # [E, 1]
        masked = jnp.where(D > 0.0, s_h, -1e30)                     # [E, N]
        mx_dst = jnp.max(masked, axis=0, keepdims=True)             # [1, N] per-dst max
        mx_edge = jnp.sum(D * mx_dst, axis=1, keepdims=True)        # [E, 1] gather back
        max_e = max_e + jnp.where(col_h, mx_edge, 0.0)              # place into col h
    e = jnp.exp(scores - max_e)                                     # [E, H]
    denom = dot_t(D, e)                                             # [N, H] per-dst sum
    probs = e * pl.reciprocal(dot(D, denom), approx=False)          # [E, H]

    # --- u_mul_e_sum: x.reshape(N, head_dim, H) * probs summed into dst -----
    xs = dot(S, x1)                                                 # [E, dim] src feats
    dim_iota = lax.broadcasted_iota(jnp.int32, xs.shape, 1) % num_heads
    probs_b = jnp.zeros_like(xs)                                    # probs_b[:, j] = probs[:, j % H]
    for h in range(num_heads):
        p_h = jnp.sum(jnp.where(head_iota == h, probs, 0.0), axis=1, keepdims=True)
        probs_b = probs_b + jnp.where(dim_iota == h, p_h, 0.0)
    agg = dot_t(D, xs * probs_b)                                    # [N, dim]

    # --- feed-forward module (dropout = identity at inference) --------------
    h1 = dot(agg, w1_ref[...]) + b1_ref[...]
    h1 = _gelu_exact(h1)
    out_ref[...] = dot(h1, w2_ref[...]) + b2_ref[...]


def dgat_forward(x, edge_feat, src, dst, params, num_heads):
    n, dim = x.shape
    n_edges = edge_feat.shape[0]
    hidden = params['w1'].shape[1]
    f32 = jnp.float32

    # One-hot incidence matrices; 0/1 are exact in bf16 -> half HBM/VMEM cost.
    src1h = jax.nn.one_hot(src, n, dtype=jnp.bfloat16)      # [E, N]
    dst1h = jax.nn.one_hot(dst, n, dtype=jnp.bfloat16)      # [E, N]

    # Fold edge_linear -> attn_edges (the edge_linear output feeds nothing else).
    w_eae = params['w_edge'] @ params['w_ae']                        # [2, H]
    b_eae = params['b_edge'] @ params['w_ae'] + params['b_ae']       # [1, H]

    inputs = (x, edge_feat, src1h, dst1h,
              params['w_in'], params['b_in'],
              params['w_u'], params['b_u'], params['w_v'],
              w_eae, b_eae,
              params['w1'], params['b1'], params['w2'], params['b2'])

    flops = int(
        2 * n_edges * n * (4 * num_heads + 2 * dim)   # incidence gathers / scatters
        + 2 * n * dim * (dim + 2 * num_heads)         # input + attention projections
        + 2 * n_edges * 2 * num_heads                 # folded edge projection
        + 4 * n * dim * hidden)                       # feed-forward
    transcendentals = int(n_edges * num_heads + n * hidden)
    bytes_accessed = int(sum(int(np.prod(a.shape)) * a.dtype.itemsize for a in inputs)
                         + n * dim * 4)

    kernel = functools.partial(dgat_kernel, num_heads)
    return pl.pallas_call(
        kernel,
        out_shape=jax.ShapeDtypeStruct((n, dim), f32),
        in_specs=[pl.BlockSpec(memory_space=pltpu.MemorySpace.VMEM)] * len(inputs),
        out_specs=pl.BlockSpec(memory_space=pltpu.MemorySpace.VMEM),
        cost_estimate=pl.CostEstimate(flops=flops,
                                      transcendentals=transcendentals,
                                      bytes_accessed=bytes_accessed),
    )(*inputs)


def dgat_reference(x, edge_feat, src, dst, params, num_heads):
    # Pure-JAX reference mirroring the PyTorch/DGL semantics (unfused weights).
    n, dim = x.shape
    head_dim = dim // num_heads
    x1 = x @ params['w_in'] + params['b_in']
    ea = edge_feat @ params['w_edge'] + params['b_edge']
    au = x1 @ params['w_u'] + params['b_u']
    av = x1 @ params['w_v']
    ae = ea @ params['w_ae'] + params['b_ae']
    s = au[src] + av[dst] + ae                                   # ops.u_add_v + e
    s = jnp.where(s >= 0, s, 0.2 * s)                            # LeakyReLU(0.2)
    mx = jax.ops.segment_max(s, dst, num_segments=n)             # edge_softmax
    e = jnp.exp(s - mx[dst])
    denom = jax.ops.segment_sum(e, dst, num_segments=n)
    probs = e / denom[dst]
    xr = x1.reshape(n, head_dim, num_heads)
    msg = xr[src] * probs[:, None, :]                            # ops.u_mul_e_sum
    agg = jax.ops.segment_sum(msg, dst, num_segments=n).reshape(n, dim)
    h = agg @ params['w1'] + params['b1']
    h = 0.5 * h * (1.0 + jax.scipy.special.erf(h / jnp.sqrt(2.0)))
    return h @ params['w2'] + params['b2']


if __name__ == "__main__":
    # module hyper-parameters (dropout=0.0 -> identity; eval mode anyway)
    dim, num_heads, hidden_mult = 32, 4, 2
    hidden = dim * hidden_mult
    n_nodes, n_edges = 16, 48

    key = jax.random.PRNGKey(0)
    keys = jax.random.split(key, 12)

    def lin(k, fan_in, fan_out, bias=True):
        kw, kb = jax.random.split(k)
        bound = 1.0 / math.sqrt(fan_in)
        w = jax.random.uniform(kw, (fan_in, fan_out), jnp.float32, -bound, bound)
        if bias:
            b = jax.random.uniform(kb, (1, fan_out), jnp.float32, -bound, bound)
            return w, b
        return (w,)

    w_in, b_in = lin(keys[0], dim, dim)               # input_linear
    w_edge, b_edge = lin(keys[1], 2, dim)             # edge_linear
    w_u, b_u = lin(keys[2], dim, num_heads)           # attn_linear_u
    (w_v,) = lin(keys[3], dim, num_heads, bias=False) # attn_linear_v (no bias)
    w_ae, b_ae = lin(keys[4], dim, num_heads)         # attn_edges
    w1, b1 = lin(keys[5], dim, hidden)                # feed_forward linear_1
    w2, b2 = lin(keys[6], hidden, dim)                # feed_forward linear_2
    params = dict(w_in=w_in, b_in=b_in, w_edge=w_edge, b_edge=b_edge,
                  w_u=w_u, b_u=b_u, w_v=w_v, w_ae=w_ae, b_ae=b_ae,
                  w1=w1, b1=b1, w2=w2, b2=b2)

    x = jax.random.normal(keys[7], (n_nodes, dim), jnp.float32)
    edge_feat = jax.random.normal(keys[8], (n_edges, 2), jnp.float32)
    src = jax.random.randint(keys[9], (n_edges,), 0, n_nodes)
    dst = jax.random.randint(keys[10], (n_edges,), 0, n_nodes)

    out = dgat_forward(x, edge_feat, src, dst, params, num_heads)
    out = jax.block_until_ready(out)

    ref = dgat_reference(x, edge_feat, src, dst, params, num_heads)
    np.testing.assert_allclose(np.asarray(out), np.asarray(ref), rtol=2e-4, atol=2e-4)
    print("KERNEL_OK")
</pallas_src>

<mosaic_0001>
module attributes {stable_mosaic.version = 11 : i64} {
  func.func @dgat_kernel(%arg0: memref<16x32xf32, #tpu.memory_space<vmem>>, %arg1: memref<48x2xf32, #tpu.memory_space<vmem>>, %arg2: memref<48x16xbf16, #tpu.memory_space<vmem>>, %arg3: memref<48x16xbf16, #tpu.memory_space<vmem>>, %arg4: memref<32x32xf32, #tpu.memory_space<vmem>>, %arg5: memref<1x32xf32, #tpu.memory_space<vmem>>, %arg6: memref<32x4xf32, #tpu.memory_space<vmem>>, %arg7: memref<1x4xf32, #tpu.memory_space<vmem>>, %arg8: memref<32x4xf32, #tpu.memory_space<vmem>>, %arg9: memref<2x4xf32, #tpu.memory_space<vmem>>, %arg10: memref<1x4xf32, #tpu.memory_space<vmem>>, %arg11: memref<32x64xf32, #tpu.memory_space<vmem>>, %arg12: memref<1x64xf32, #tpu.memory_space<vmem>>, %arg13: memref<64x32xf32, #tpu.memory_space<vmem>>, %arg14: memref<1x32xf32, #tpu.memory_space<vmem>>, %arg15: memref<16x32xf32, #tpu.memory_space<vmem>>) attributes {dimension_semantics = [], scalar_prefetch = 0 : i64, scratch_operands = 0 : i64, tpu.core_type = #tpu.core_type<tc>} {
    %c0 = arith.constant 0 : index
    %c0_0 = arith.constant 0 : index
    %0 = vector.load %arg2[%c0, %c0_0] : memref<48x16xbf16, #tpu.memory_space<vmem>>, vector<48x16xbf16>
    %1 = arith.extf %0 : vector<48x16xbf16> to vector<48x16xf32>
    %c0_1 = arith.constant 0 : index
    %c0_2 = arith.constant 0 : index
    %2 = vector.load %arg3[%c0_1, %c0_2] : memref<48x16xbf16, #tpu.memory_space<vmem>>, vector<48x16xbf16>
    %3 = arith.extf %2 : vector<48x16xbf16> to vector<48x16xf32>
    %c0_3 = arith.constant 0 : index
    %c0_4 = arith.constant 0 : index
    %4 = vector.load %arg0[%c0_3, %c0_4] : memref<16x32xf32, #tpu.memory_space<vmem>>, vector<16x32xf32>
    %c0_5 = arith.constant 0 : index
    %c0_6 = arith.constant 0 : index
    %5 = vector.load %arg4[%c0_5, %c0_6] : memref<32x32xf32, #tpu.memory_space<vmem>>, vector<32x32xf32>
    %cst = arith.constant dense<0.000000e+00> : vector<16x32xf32>
    %6 = tpu.matmul %4, %5, %cst {dimension_numbers = #tpu.dot_dimension_numbers<[1], [0], [0], [1], [0, 0, 1, 1], [], []>} : vector<16x32xf32>, vector<32x32xf32>, vector<16x32xf32> -> vector<16x32xf32>
    %c0_7 = arith.constant 0 : index
    %c0_8 = arith.constant 0 : index
    %7 = vector.load %arg5[%c0_7, %c0_8] : memref<1x32xf32, #tpu.memory_space<vmem>>, vector<1x32xf32>
    %8 = vector.broadcast %7 : vector<1x32xf32> to vector<16x32xf32>
    %9 = arith.addf %6, %8 : vector<16x32xf32>
    %c0_9 = arith.constant 0 : index
    %c0_10 = arith.constant 0 : index
    %10 = vector.load %arg1[%c0_9, %c0_10] : memref<48x2xf32, #tpu.memory_space<vmem>>, vector<48x2xf32>
    %c0_11 = arith.constant 0 : index
    %c0_12 = arith.constant 0 : index
    %11 = vector.load %arg9[%c0_11, %c0_12] : memref<2x4xf32, #tpu.memory_space<vmem>>, vector<2x4xf32>
    %cst_13 = arith.constant dense<0.000000e+00> : vector<48x4xf32>
    %12 = tpu.matmul %10, %11, %cst_13 {dimension_numbers = #tpu.dot_dimension_numbers<[1], [0], [0], [1], [0, 0, 1, 1], [], []>} : vector<48x2xf32>, vector<2x4xf32>, vector<48x4xf32> -> vector<48x4xf32>
    %c0_14 = arith.constant 0 : index
    %c0_15 = arith.constant 0 : index
    %13 = vector.load %arg10[%c0_14, %c0_15] : memref<1x4xf32, #tpu.memory_space<vmem>>, vector<1x4xf32>
    %14 = vector.broadcast %13 : vector<1x4xf32> to vector<48x4xf32>
    %15 = arith.addf %12, %14 : vector<48x4xf32>
    %c0_16 = arith.constant 0 : index
    %c0_17 = arith.constant 0 : index
    %16 = vector.load %arg6[%c0_16, %c0_17] : memref<32x4xf32, #tpu.memory_space<vmem>>, vector<32x4xf32>
    %cst_18 = arith.constant dense<0.000000e+00> : vector<16x4xf32>
    %17 = tpu.matmul %9, %16, %cst_18 {dimension_numbers = #tpu.dot_dimension_numbers<[1], [0], [0], [1], [0, 0, 1, 1], [], []>} : vector<16x32xf32>, vector<32x4xf32>, vector<16x4xf32> -> vector<16x4xf32>
    %c0_19 = arith.constant 0 : index
    %c0_20 = arith.constant 0 : index
    %18 = vector.load %arg7[%c0_19, %c0_20] : memref<1x4xf32, #tpu.memory_space<vmem>>, vector<1x4xf32>
    %19 = vector.broadcast %18 : vector<1x4xf32> to vector<16x4xf32>
    %20 = arith.addf %17, %19 : vector<16x4xf32>
    %c0_21 = arith.constant 0 : index
    %c0_22 = arith.constant 0 : index
    %21 = vector.load %arg8[%c0_21, %c0_22] : memref<32x4xf32, #tpu.memory_space<vmem>>, vector<32x4xf32>
    %cst_23 = arith.constant dense<0.000000e+00> : vector<16x4xf32>
    %22 = tpu.matmul %9, %21, %cst_23 {dimension_numbers = #tpu.dot_dimension_numbers<[1], [0], [0], [1], [0, 0, 1, 1], [], []>} : vector<16x32xf32>, vector<32x4xf32>, vector<16x4xf32> -> vector<16x4xf32>
    %cst_24 = arith.constant dense<0.000000e+00> : vector<48x4xf32>
    %23 = tpu.matmul %1, %20, %cst_24 {dimension_numbers = #tpu.dot_dimension_numbers<[1], [0], [0], [1], [0, 0, 1, 1], [], []>} : vector<48x16xf32>, vector<16x4xf32>, vector<48x4xf32> -> vector<48x4xf32>
    %cst_25 = arith.constant dense<0.000000e+00> : vector<48x4xf32>
    %24 = tpu.matmul %3, %22, %cst_25 {dimension_numbers = #tpu.dot_dimension_numbers<[1], [0], [0], [1], [0, 0, 1, 1], [], []>} : vector<48x16xf32>, vector<16x4xf32>, vector<48x4xf32> -> vector<48x4xf32>
    %25 = arith.addf %23, %24 : vector<48x4xf32>
    %26 = arith.addf %25, %15 : vector<48x4xf32>
    %cst_26 = arith.constant 0.000000e+00 : f32
    %27 = vector.broadcast %cst_26 : f32 to vector<48x4xf32>
    %28 = arith.cmpf oge, %26, %27 : vector<48x4xf32>
    %cst_27 = arith.constant 2.000000e-01 : f32
    %29 = vector.broadcast %cst_27 : f32 to vector<48x4xf32>
    %30 = arith.mulf %29, %26 : vector<48x4xf32>
    %31 = arith.select %28, %26, %30 : vector<48x4xi1>, vector<48x4xf32>
    %32 = tpu.iota {dimensions = array<i32: 1>} : vector<48x4xi32>
    %cst_28 = arith.constant 0.000000e+00 : f32
    %33 = vector.broadcast %cst_28 : f32 to vector<48x4xf32>
    %c0_i32 = arith.constant 0 : i32
    %34 = vector.broadcast %c0_i32 : i32 to vector<48x4xi32>
    %35 = arith.cmpi eq, %32, %34 : vector<48x4xi32>
    %cst_29 = arith.constant 0.000000e+00 : f32
    %36 = vector.broadcast %cst_29 : f32 to vector<48x4xf32>
    %37 = arith.select %35, %31, %36 : vector<48x4xi1>, vector<48x4xf32>
    %cst_30 = arith.constant dense<0.000000e+00> : vector<48xf32>
    %38 = vector.multi_reduction <add>, %37, %cst_30 [1] : vector<48x4xf32> to vector<48xf32>
    %39 = vector.shape_cast %38 : vector<48xf32> to vector<48x1xf32>
    %cst_31 = arith.constant 0.000000e+00 : f32
    %40 = vector.broadcast %cst_31 : f32 to vector<48x16xf32>
    %41 = arith.cmpf ogt, %3, %40 : vector<48x16xf32>
    %cst_32 = arith.constant -1.000000e+30 : f32
    %42 = vector.shape_cast %39 : vector<48x1xf32> to vector<48x1xf32>
    %43 = vector.broadcast %42 : vector<48x1xf32> to vector<48x16xf32>
    %44 = vector.broadcast %cst_32 : f32 to vector<48x16xf32>
    %45 = arith.select %41, %43, %44 : vector<48x16xi1>, vector<48x16xf32>
    %cst_33 = arith.constant dense<0xFF800000> : vector<16xf32>
    %46 = vector.multi_reduction <maximumf>, %45, %cst_33 [0] : vector<48x16xf32> to vector<16xf32>
    %47 = vector.shape_cast %46 : vector<16xf32> to vector<1x16xf32>
    %48 = vector.broadcast %47 : vector<1x16xf32> to vector<48x16xf32>
    %49 = arith.mulf %3, %48 : vector<48x16xf32>
    %cst_34 = arith.constant dense<0.000000e+00> : vector<48xf32>
    %50 = vector.multi_reduction <add>, %49, %cst_34 [1] : vector<48x16xf32> to vector<48xf32>
    %51 = vector.shape_cast %50 : vector<48xf32> to vector<48x1xf32>
    %cst_35 = arith.constant 0.000000e+00 : f32
    %52 = vector.shape_cast %51 : vector<48x1xf32> to vector<48x1xf32>
    %53 = vector.broadcast %52 : vector<48x1xf32> to vector<48x4xf32>
    %54 = vector.broadcast %cst_35 : f32 to vector<48x4xf32>
    %55 = arith.select %35, %53, %54 : vector<48x4xi1>, vector<48x4xf32>
    %56 = arith.addf %33, %55 : vector<48x4xf32>
    %c1_i32 = arith.constant 1 : i32
    %57 = vector.broadcast %c1_i32 : i32 to vector<48x4xi32>
    %58 = arith.cmpi eq, %32, %57 : vector<48x4xi32>
    %cst_36 = arith.constant 0.000000e+00 : f32
    %59 = vector.broadcast %cst_36 : f32 to vector<48x4xf32>
    %60 = arith.select %58, %31, %59 : vector<48x4xi1>, vector<48x4xf32>
    %cst_37 = arith.constant dense<0.000000e+00> : vector<48xf32>
    %61 = vector.multi_reduction <add>, %60, %cst_37 [1] : vector<48x4xf32> to vector<48xf32>
    %62 = vector.shape_cast %61 : vector<48xf32> to vector<48x1xf32>
    %cst_38 = arith.constant 0.000000e+00 : f32
    %63 = vector.broadcast %cst_38 : f32 to vector<48x16xf32>
    %64 = arith.cmpf ogt, %3, %63 : vector<48x16xf32>
    %cst_39 = arith.constant -1.000000e+30 : f32
    %65 = vector.shape_cast %62 : vector<48x1xf32> to vector<48x1xf32>
    %66 = vector.broadcast %65 : vector<48x1xf32> to vector<48x16xf32>
    %67 = vector.broadcast %cst_39 : f32 to vector<48x16xf32>
    %68 = arith.select %64, %66, %67 : vector<48x16xi1>, vector<48x16xf32>
    %cst_40 = arith.constant dense<0xFF800000> : vector<16xf32>
    %69 = vector.multi_reduction <maximumf>, %68, %cst_40 [0] : vector<48x16xf32> to vector<16xf32>
    %70 = vector.shape_cast %69 : vector<16xf32> to vector<1x16xf32>
    %71 = vector.broadcast %70 : vector<1x16xf32> to vector<48x16xf32>
    %72 = arith.mulf %3, %71 : vector<48x16xf32>
    %cst_41 = arith.constant dense<0.000000e+00> : vector<48xf32>
    %73 = vector.multi_reduction <add>, %72, %cst_41 [1] : vector<48x16xf32> to vector<48xf32>
    %74 = vector.shape_cast %73 : vector<48xf32> to vector<48x1xf32>
    %cst_42 = arith.constant 0.000000e+00 : f32
    %75 = vector.shape_cast %74 : vector<48x1xf32> to vector<48x1xf32>
    %76 = vector.broadcast %75 : vector<48x1xf32> to vector<48x4xf32>
    %77 = vector.broadcast %cst_42 : f32 to vector<48x4xf32>
    %78 = arith.select %58, %76, %77 : vector<48x4xi1>, vector<48x4xf32>
    %79 = arith.addf %56, %78 : vector<48x4xf32>
    %c2_i32 = arith.constant 2 : i32
    %80 = vector.broadcast %c2_i32 : i32 to vector<48x4xi32>
    %81 = arith.cmpi eq, %32, %80 : vector<48x4xi32>
    %cst_43 = arith.constant 0.000000e+00 : f32
    %82 = vector.broadcast %cst_43 : f32 to vector<48x4xf32>
    %83 = arith.select %81, %31, %82 : vector<48x4xi1>, vector<48x4xf32>
    %cst_44 = arith.constant dense<0.000000e+00> : vector<48xf32>
    %84 = vector.multi_reduction <add>, %83, %cst_44 [1] : vector<48x4xf32> to vector<48xf32>
    %85 = vector.shape_cast %84 : vector<48xf32> to vector<48x1xf32>
    %cst_45 = arith.constant 0.000000e+00 : f32
    %86 = vector.broadcast %cst_45 : f32 to vector<48x16xf32>
    %87 = arith.cmpf ogt, %3, %86 : vector<48x16xf32>
    %cst_46 = arith.constant -1.000000e+30 : f32
    %88 = vector.shape_cast %85 : vector<48x1xf32> to vector<48x1xf32>
    %89 = vector.broadcast %88 : vector<48x1xf32> to vector<48x16xf32>
    %90 = vector.broadcast %cst_46 : f32 to vector<48x16xf32>
    %91 = arith.select %87, %89, %90 : vector<48x16xi1>, vector<48x16xf32>
    %cst_47 = arith.constant dense<0xFF800000> : vector<16xf32>
    %92 = vector.multi_reduction <maximumf>, %91, %cst_47 [0] : vector<48x16xf32> to vector<16xf32>
    %93 = vector.shape_cast %92 : vector<16xf32> to vector<1x16xf32>
    %94 = vector.broadcast %93 : vector<1x16xf32> to vector<48x16xf32>
    %95 = arith.mulf %3, %94 : vector<48x16xf32>
    %cst_48 = arith.constant dense<0.000000e+00> : vector<48xf32>
    %96 = vector.multi_reduction <add>, %95, %cst_48 [1] : vector<48x16xf32> to vector<48xf32>
    %97 = vector.shape_cast %96 : vector<48xf32> to vector<48x1xf32>
    %cst_49 = arith.constant 0.000000e+00 : f32
    %98 = vector.shape_cast %97 : vector<48x1xf32> to vector<48x1xf32>
    %99 = vector.broadcast %98 : vector<48x1xf32> to vector<48x4xf32>
    %100 = vector.broadcast %cst_49 : f32 to vector<48x4xf32>
    %101 = arith.select %81, %99, %100 : vector<48x4xi1>, vector<48x4xf32>
    %102 = arith.addf %79, %101 : vector<48x4xf32>
    %c3_i32 = arith.constant 3 : i32
    %103 = vector.broadcast %c3_i32 : i32 to vector<48x4xi32>
    %104 = arith.cmpi eq, %32, %103 : vector<48x4xi32>
    %cst_50 = arith.constant 0.000000e+00 : f32
    %105 = vector.broadcast %cst_50 : f32 to vector<48x4xf32>
    %106 = arith.select %104, %31, %105 : vector<48x4xi1>, vector<48x4xf32>
    %cst_51 = arith.constant dense<0.000000e+00> : vector<48xf32>
    %107 = vector.multi_reduction <add>, %106, %cst_51 [1] : vector<48x4xf32> to vector<48xf32>
    %108 = vector.shape_cast %107 : vector<48xf32> to vector<48x1xf32>
    %cst_52 = arith.constant 0.000000e+00 : f32
    %109 = vector.broadcast %cst_52 : f32 to vector<48x16xf32>
    %110 = arith.cmpf ogt, %3, %109 : vector<48x16xf32>
    %cst_53 = arith.constant -1.000000e+30 : f32
    %111 = vector.shape_cast %108 : vector<48x1xf32> to vector<48x1xf32>
    %112 = vector.broadcast %111 : vector<48x1xf32> to vector<48x16xf32>
    %113 = vector.broadcast %cst_53 : f32 to vector<48x16xf32>
    %114 = arith.select %110, %112, %113 : vector<48x16xi1>, vector<48x16xf32>
    %cst_54 = arith.constant dense<0xFF800000> : vector<16xf32>
    %115 = vector.multi_reduction <maximumf>, %114, %cst_54 [0] : vector<48x16xf32> to vector<16xf32>
    %116 = vector.shape_cast %115 : vector<16xf32> to vector<1x16xf32>
    %117 = vector.broadcast %116 : vector<1x16xf32> to vector<48x16xf32>
    %118 = arith.mulf %3, %117 : vector<48x16xf32>
    %cst_55 = arith.constant dense<0.000000e+00> : vector<48xf32>
    %119 = vector.multi_reduction <add>, %118, %cst_55 [1] : vector<48x16xf32> to vector<48xf32>
    %120 = vector.shape_cast %119 : vector<48xf32> to vector<48x1xf32>
    %cst_56 = arith.constant 0.000000e+00 : f32
    %121 = vector.shape_cast %120 : vector<48x1xf32> to vector<48x1xf32>
    %122 = vector.broadcast %121 : vector<48x1xf32> to vector<48x4xf32>
    %123 = vector.broadcast %cst_56 : f32 to vector<48x4xf32>
    %124 = arith.select %104, %122, %123 : vector<48x4xi1>, vector<48x4xf32>
    %125 = arith.addf %102, %124 : vector<48x4xf32>
    %126 = arith.subf %31, %125 : vector<48x4xf32>
    %127 = math.exp %126 : vector<48x4xf32>
    %cst_57 = arith.constant dense<0.000000e+00> : vector<16x4xf32>
    %128 = tpu.matmul %3, %127, %cst_57 {dimension_numbers = #tpu.dot_dimension_numbers<[0], [0], [1], [1], [0, 1, 1, 1], [], []>} : vector<48x16xf32>, vector<48x4xf32>, vector<16x4xf32> -> vector<16x4xf32>
    %cst_58 = arith.constant dense<0.000000e+00> : vector<48x4xf32>
    %129 = tpu.matmul %3, %128, %cst_58 {dimension_numbers = #tpu.dot_dimension_numbers<[1], [0], [0], [1], [0, 0, 1, 1], [], []>} : vector<48x16xf32>, vector<16x4xf32>, vector<48x4xf32> -> vector<48x4xf32>
    %130 = tpu.reciprocal %129 : vector<48x4xf32> -> vector<48x4xf32>
    %131 = arith.mulf %127, %130 : vector<48x4xf32>
    %cst_59 = arith.constant dense<0.000000e+00> : vector<48x32xf32>
    %132 = tpu.matmul %1, %9, %cst_59 {dimension_numbers = #tpu.dot_dimension_numbers<[1], [0], [0], [1], [0, 0, 1, 1], [], []>} : vector<48x16xf32>, vector<16x32xf32>, vector<48x32xf32> -> vector<48x32xf32>
    %133 = tpu.iota {dimensions = array<i32: 1>} : vector<48x32xi32>
    %c4_i32 = arith.constant 4 : i32
    %c0_i32_60 = arith.constant 0 : i32
    %134 = arith.cmpi eq, %c4_i32, %c0_i32_60 : i32
    %c1_i32_61 = arith.constant 1 : i32
    %135 = arith.select %134, %c1_i32_61, %c4_i32 : i32
    %136 = vector.broadcast %135 : i32 to vector<48x32xi32>
    %137 = arith.remsi %133, %136 : vector<48x32xi32>
    %c0_i32_62 = arith.constant 0 : i32
    %138 = vector.broadcast %c0_i32_62 : i32 to vector<48x32xi32>
    %139 = arith.cmpi ne, %137, %138 : vector<48x32xi32>
    %c0_i32_63 = arith.constant 0 : i32
    %140 = vector.broadcast %c0_i32_63 : i32 to vector<48x32xi32>
    %141 = arith.cmpi slt, %137, %140 : vector<48x32xi32>
    %c0_i32_64 = arith.constant 0 : i32
    %142 = arith.cmpi slt, %135, %c0_i32_64 : i32
    %143 = vector.broadcast %142 : i1 to vector<48x32xi1>
    %144 = vector.broadcast %143 : vector<48x32xi1> to vector<48x32xi1>
    %145 = arith.xori %141, %144 : vector<48x32xi1>
    %146 = arith.andi %145, %139 : vector<48x32xi1>
    %147 = vector.broadcast %135 : i32 to vector<48x32xi32>
    %148 = arith.addi %137, %147 : vector<48x32xi32>
    %149 = arith.select %146, %148, %137 : vector<48x32xi1>, vector<48x32xi32>
    %cst_65 = arith.constant 0.000000e+00 : f32
    %150 = vector.broadcast %cst_65 : f32 to vector<48x32xf32>
    %c0_i32_66 = arith.constant 0 : i32
    %151 = vector.broadcast %c0_i32_66 : i32 to vector<48x4xi32>
    %152 = arith.cmpi eq, %32, %151 : vector<48x4xi32>
    %cst_67 = arith.constant 0.000000e+00 : f32
    %153 = vector.broadcast %cst_67 : f32 to vector<48x4xf32>
    %154 = arith.select %152, %131, %153 : vector<48x4xi1>, vector<48x4xf32>
    %cst_68 = arith.constant dense<0.000000e+00> : vector<48xf32>
    %155 = vector.multi_reduction <add>, %154, %cst_68 [1] : vector<48x4xf32> to vector<48xf32>
    %156 = vector.shape_cast %155 : vector<48xf32> to vector<48x1xf32>
    %c0_i32_69 = arith.constant 0 : i32
    %157 = vector.broadcast %c0_i32_69 : i32 to vector<48x32xi32>
    %158 = arith.cmpi eq, %149, %157 : vector<48x32xi32>
    %cst_70 = arith.constant 0.000000e+00 : f32
    %159 = vector.shape_cast %156 : vector<48x1xf32> to vector<48x1xf32>
    %160 = vector.broadcast %159 : vector<48x1xf32> to vector<48x32xf32>
    %161 = vector.broadcast %cst_70 : f32 to vector<48x32xf32>
    %162 = arith.select %158, %160, %161 : vector<48x32xi1>, vector<48x32xf32>
    %163 = arith.addf %150, %162 : vector<48x32xf32>
    %c1_i32_71 = arith.constant 1 : i32
    %164 = vector.broadcast %c1_i32_71 : i32 to vector<48x4xi32>
    %165 = arith.cmpi eq, %32, %164 : vector<48x4xi32>
    %cst_72 = arith.constant 0.000000e+00 : f32
    %166 = vector.broadcast %cst_72 : f32 to vector<48x4xf32>
    %167 = arith.select %165, %131, %166 : vector<48x4xi1>, vector<48x4xf32>
    %cst_73 = arith.constant dense<0.000000e+00> : vector<48xf32>
    %168 = vector.multi_reduction <add>, %167, %cst_73 [1] : vector<48x4xf32> to vector<48xf32>
    %169 = vector.shape_cast %168 : vector<48xf32> to vector<48x1xf32>
    %c1_i32_74 = arith.constant 1 : i32
    %170 = vector.broadcast %c1_i32_74 : i32 to vector<48x32xi32>
    %171 = arith.cmpi eq, %149, %170 : vector<48x32xi32>
    %cst_75 = arith.constant 0.000000e+00 : f32
    %172 = vector.shape_cast %169 : vector<48x1xf32> to vector<48x1xf32>
    %173 = vector.broadcast %172 : vector<48x1xf32> to vector<48x32xf32>
    %174 = vector.broadcast %cst_75 : f32 to vector<48x32xf32>
    %175 = arith.select %171, %173, %174 : vector<48x32xi1>, vector<48x32xf32>
    %176 = arith.addf %163, %175 : vector<48x32xf32>
    %c2_i32_76 = arith.constant 2 : i32
    %177 = vector.broadcast %c2_i32_76 : i32 to vector<48x4xi32>
    %178 = arith.cmpi eq, %32, %177 : vector<48x4xi32>
    %cst_77 = arith.constant 0.000000e+00 : f32
    %179 = vector.broadcast %cst_77 : f32 to vector<48x4xf32>
    %180 = arith.select %178, %131, %179 : vector<48x4xi1>, vector<48x4xf32>
    %cst_78 = arith.constant dense<0.000000e+00> : vector<48xf32>
    %181 = vector.multi_reduction <add>, %180, %cst_78 [1] : vector<48x4xf32> to vector<48xf32>
    %182 = vector.shape_cast %181 : vector<48xf32> to vector<48x1xf32>
    %c2_i32_79 = arith.constant 2 : i32
    %183 = vector.broadcast %c2_i32_79 : i32 to vector<48x32xi32>
    %184 = arith.cmpi eq, %149, %183 : vector<48x32xi32>
    %cst_80 = arith.constant 0.000000e+00 : f32
    %185 = vector.shape_cast %182 : vector<48x1xf32> to vector<48x1xf32>
    %186 = vector.broadcast %185 : vector<48x1xf32> to vector<48x32xf32>
    %187 = vector.broadcast %cst_80 : f32 to vector<48x32xf32>
    %188 = arith.select %184, %186, %187 : vector<48x32xi1>, vector<48x32xf32>
    %189 = arith.addf %176, %188 : vector<48x32xf32>
    %c3_i32_81 = arith.constant 3 : i32
    %190 = vector.broadcast %c3_i32_81 : i32 to vector<48x4xi32>
    %191 = arith.cmpi eq, %32, %190 : vector<48x4xi32>
    %cst_82 = arith.constant 0.000000e+00 : f32
    %192 = vector.broadcast %cst_82 : f32 to vector<48x4xf32>
    %193 = arith.select %191, %131, %192 : vector<48x4xi1>, vector<48x4xf32>
    %cst_83 = arith.constant dense<0.000000e+00> : vector<48xf32>
    %194 = vector.multi_reduction <add>, %193, %cst_83 [1] : vector<48x4xf32> to vector<48xf32>
    %195 = vector.shape_cast %194 : vector<48xf32> to vector<48x1xf32>
    %c3_i32_84 = arith.constant 3 : i32
    %196 = vector.broadcast %c3_i32_84 : i32 to vector<48x32xi32>
    %197 = arith.cmpi eq, %149, %196 : vector<48x32xi32>
    %cst_85 = arith.constant 0.000000e+00 : f32
    %198 = vector.shape_cast %195 : vector<48x1xf32> to vector<48x1xf32>
    %199 = vector.broadcast %198 : vector<48x1xf32> to vector<48x32xf32>
    %200 = vector.broadcast %cst_85 : f32 to vector<48x32xf32>
    %201 = arith.select %197, %199, %200 : vector<48x32xi1>, vector<48x32xf32>
    %202 = arith.addf %189, %201 : vector<48x32xf32>
    %203 = arith.mulf %132, %202 : vector<48x32xf32>
    %cst_86 = arith.constant dense<0.000000e+00> : vector<16x32xf32>
    %204 = tpu.matmul %3, %203, %cst_86 {dimension_numbers = #tpu.dot_dimension_numbers<[0], [0], [1], [1], [0, 1, 1, 1], [], []>} : vector<48x16xf32>, vector<48x32xf32>, vector<16x32xf32> -> vector<16x32xf32>
    %c0_87 = arith.constant 0 : index
    %c0_88 = arith.constant 0 : index
    %205 = vector.load %arg11[%c0_87, %c0_88] : memref<32x64xf32, #tpu.memory_space<vmem>>, vector<32x64xf32>
    %cst_89 = arith.constant dense<0.000000e+00> : vector<16x64xf32>
    %206 = tpu.matmul %204, %205, %cst_89 {dimension_numbers = #tpu.dot_dimension_numbers<[1], [0], [0], [1], [0, 0, 1, 1], [], []>} : vector<16x32xf32>, vector<32x64xf32>, vector<16x64xf32> -> vector<16x64xf32>
    %c0_90 = arith.constant 0 : index
    %c0_91 = arith.constant 0 : index
    %207 = vector.load %arg12[%c0_90, %c0_91] : memref<1x64xf32, #tpu.memory_space<vmem>>, vector<1x64xf32>
    %208 = vector.broadcast %207 : vector<1x64xf32> to vector<16x64xf32>
    %209 = arith.addf %206, %208 : vector<16x64xf32>
    %cst_92 = arith.constant 5.000000e-01 : f32
    %210 = vector.broadcast %cst_92 : f32 to vector<16x64xf32>
    %211 = arith.mulf %210, %209 : vector<16x64xf32>
    %cst_93 = arith.constant 0.707106769 : f32
    %212 = vector.broadcast %cst_93 : f32 to vector<16x64xf32>
    %213 = arith.mulf %209, %212 : vector<16x64xf32>
    %214 = math.absf %213 : vector<16x64xf32>
    %cst_94 = arith.constant 5.000000e-01 : f32
    %215 = vector.broadcast %cst_94 : f32 to vector<16x64xf32>
    %216 = arith.mulf %215, %214 : vector<16x64xf32>
    %cst_95 = arith.constant 1.000000e+00 : f32
    %217 = vector.broadcast %cst_95 : f32 to vector<16x64xf32>
    %218 = arith.addf %217, %216 : vector<16x64xf32>
    %219 = tpu.reciprocal %218 : vector<16x64xf32> -> vector<16x64xf32>
    %cst_96 = arith.constant 0.170872763 : f32
    %220 = vector.broadcast %cst_96 : f32 to vector<16x64xf32>
    %221 = arith.mulf %219, %220 : vector<16x64xf32>
    %cst_97 = arith.constant -0.822152256 : f32
    %222 = vector.broadcast %cst_97 : f32 to vector<16x64xf32>
    %223 = arith.addf %222, %221 : vector<16x64xf32>
    %224 = arith.mulf %219, %223 : vector<16x64xf32>
    %cst_98 = arith.constant 1.48851585 : f32
    %225 = vector.broadcast %cst_98 : f32 to vector<16x64xf32>
    %226 = arith.addf %225, %224 : vector<16x64xf32>
    %227 = arith.mulf %219, %226 : vector<16x64xf32>
    %cst_99 = arith.constant -1.13520396 : f32
    %228 = vector.broadcast %cst_99 : f32 to vector<16x64xf32>
    %229 = arith.addf %228, %227 : vector<16x64xf32>
    %230 = arith.mulf %219, %229 : vector<16x64xf32>
    %cst_100 = arith.constant 0.278868079 : f32
    %231 = vector.broadcast %cst_100 : f32 to vector<16x64xf32>
    %232 = arith.addf %231, %230 : vector<16x64xf32>
    %233 = arith.mulf %219, %232 : vector<16x64xf32>
    %cst_101 = arith.constant -0.186288059 : f32
    %234 = vector.broadcast %cst_101 : f32 to vector<16x64xf32>
    %235 = arith.addf %234, %233 : vector<16x64xf32>
    %236 = arith.mulf %219, %235 : vector<16x64xf32>
    %cst_102 = arith.constant 0.0967841818 : f32
    %237 = vector.broadcast %cst_102 : f32 to vector<16x64xf32>
    %238 = arith.addf %237, %236 : vector<16x64xf32>
    %239 = arith.mulf %219, %238 : vector<16x64xf32>
    %cst_103 = arith.constant 0.374091953 : f32
    %240 = vector.broadcast %cst_103 : f32 to vector<16x64xf32>
    %241 = arith.addf %240, %239 : vector<16x64xf32>
    %242 = arith.mulf %219, %241 : vector<16x64xf32>
    %cst_104 = arith.constant 1.00002372 : f32
    %243 = vector.broadcast %cst_104 : f32 to vector<16x64xf32>
    %244 = arith.addf %243, %242 : vector<16x64xf32>
    %245 = arith.mulf %219, %244 : vector<16x64xf32>
    %cst_105 = arith.constant -1.26551223 : f32
    %246 = vector.broadcast %cst_105 : f32 to vector<16x64xf32>
    %247 = arith.addf %246, %245 : vector<16x64xf32>
    %cst_106 = arith.constant 0.000000e+00 : f32
    %248 = vector.broadcast %cst_106 : f32 to vector<16x64xf32>
    %249 = arith.subf %248, %214 : vector<16x64xf32>
    %250 = arith.mulf %249, %214 : vector<16x64xf32>
    %251 = arith.addf %250, %247 : vector<16x64xf32>
    %252 = math.exp %251 : vector<16x64xf32>
    %253 = arith.mulf %219, %252 : vector<16x64xf32>
    %cst_107 = arith.constant 0.000000e+00 : f32
    %254 = vector.broadcast %cst_107 : f32 to vector<16x64xf32>
    %255 = arith.cmpf oge, %213, %254 : vector<16x64xf32>
    %cst_108 = arith.constant 1.000000e+00 : f32
    %256 = vector.broadcast %cst_108 : f32 to vector<16x64xf32>
    %257 = arith.subf %256, %253 : vector<16x64xf32>
    %cst_109 = arith.constant 1.000000e+00 : f32
    %258 = vector.broadcast %cst_109 : f32 to vector<16x64xf32>
    %259 = arith.subf %253, %258 : vector<16x64xf32>
    %260 = arith.select %255, %257, %259 : vector<16x64xi1>, vector<16x64xf32>
    %cst_110 = arith.constant 1.000000e+00 : f32
    %261 = vector.broadcast %cst_110 : f32 to vector<16x64xf32>
    %262 = arith.addf %261, %260 : vector<16x64xf32>
    %263 = arith.mulf %211, %262 : vector<16x64xf32>
    %c0_111 = arith.constant 0 : index
    %c0_112 = arith.constant 0 : index
    %264 = vector.load %arg13[%c0_111, %c0_112] : memref<64x32xf32, #tpu.memory_space<vmem>>, vector<64x32xf32>
    %cst_113 = arith.constant dense<0.000000e+00> : vector<16x32xf32>
    %265 = tpu.matmul %263, %264, %cst_113 {dimension_numbers = #tpu.dot_dimension_numbers<[1], [0], [0], [1], [0, 0, 1, 1], [], []>} : vector<16x64xf32>, vector<64x32xf32>, vector<16x32xf32> -> vector<16x32xf32>
    %c0_114 = arith.constant 0 : index
    %c0_115 = arith.constant 0 : index
    %266 = vector.load %arg14[%c0_114, %c0_115] : memref<1x32xf32, #tpu.memory_space<vmem>>, vector<1x32xf32>
    %267 = vector.broadcast %266 : vector<1x32xf32> to vector<16x32xf32>
    %268 = arith.addf %265, %267 : vector<16x32xf32>
    %c0_116 = arith.constant 0 : index
    %c0_117 = arith.constant 0 : index
    %269 = vector.load %arg15[%c0_116, %c0_117] : memref<16x32xf32, #tpu.memory_space<vmem>>, vector<16x32xf32>
    tpu.vector_store %arg15[%c0_116, %c0_117], %268 {strides = array<i32>} : memref<16x32xf32, #tpu.memory_space<vmem>>, vector<16x32xf32>,
    return
  }
}

</mosaic_0001>

<bundles_post_ra>
// kernel: tpu_custom_call.1
= control target key start
LH: loop header
LB: loop body
LE: loop exit
PB: predicated region body
PF: predicated region fallthrough
CT: control target
= control target key end

     0   :  { %vm88_vm0 = vcmask 261120   ;;  %vm203_vm1 = vcmask 1041408   ;;  %vm184_vm2 = vcmask 15360   ;;  %s3220_s0 = inlined_call_operand.vmem [shape: f32[16,32], index: 0, kind: input, shape index: {}]   ;;  %s3221_s1 = inlined_call_operand.vmem [shape: f32[48,2], index: 1, kind: input, shape index: {}]   ;;  %s3222_s2 = inlined_call_operand.vmem [shape: bf16[48,16], index: 2, kind: input, shape index: {}]   ;;  %s3223_s3 = inlined_call_operand.vmem [shape: bf16[48,16], index: 3, kind: input, shape index: {}]   ;;  %s3224_s4 = inlined_call_operand.vmem [shape: f32[32,32], index: 4, kind: input, shape index: {}]   ;;  %s3225_s5 = inlined_call_operand.vmem [shape: f32[1,32], index: 5, kind: input, shape index: {}]   ;;  %s3226_s6 = inlined_call_operand.vmem [shape: f32[32,4], index: 6, kind: input, shape index: {}]   ;;  %s3227_s7 = inlined_call_operand.vmem [shape: f32[1,4], index: 7, kind: input, shape index: {}]   ;;  %s3228_s8 = inlined_call_operand.vmem [shape: f32[32,4], index: 8, kind: input, shape index: {}]   ;;  %s3229_s9 = inlined_call_operand.vmem [shape: f32[2,4], index: 9, kind: input, shape index: {}]   ;;  %s3230_s10 = inlined_call_operand.vmem [shape: f32[1,4], index: 10, kind: input, shape index: {}]   ;;  %s3231_s11 = inlined_call_operand.vmem [shape: f32[32,64], index: 11, kind: input, shape index: {}]   ;;  %s3232_s12 = inlined_call_operand.vmem [shape: f32[1,64], index: 12, kind: input, shape index: {}]   ;;  %s3233_s13 = inlined_call_operand.vmem [shape: f32[64,32], index: 13, kind: input, shape index: {}]   ;;  %s3234_s14 = inlined_call_operand.vmem [shape: f32[1,32], index: 14, kind: input, shape index: {}]   ;;  %s3235_s15 = inlined_call_operand.hbm [shape: f32[16,32], index: 15, kind: output, shape index: {}]  }
   0x1   :  { %v77_v0 = vld [vmem:[%s3224_s4] sm:$0xff]  ;;  %v78_v1 = vld [vmem:[%s3224_s4 + $0x8] sm:$0xff]  ;;  %v79_v2 = vld [vmem:[%s3224_s4 + $0x10] sm:$0xff] }
   0x2   :  { %v2248_v3 = vpack.c.bf16 %v78_v1, %v77_v0  ;;  %v80_v4 = vld [vmem:[%s3224_s4 + $0x18] sm:$0xff]  ;;  %v75_v5 = vld [vmem:[%s3220_s0] sm:$0xff]  ;;  %v172_v8 = vld [vmem:[%s3221_s1 + $0x10] sm:$0xff] }
   0x3   :  { %v2252_v6 = vpack.c.bf16 %v80_v4, %v79_v2  ;;  %2100 = vmatprep.mubr.msk.f32.mxu0 %vm88_vm0, %v75_v5  ;;  %v176_v7 = vld [vmem:[%s3229_s9] sm:$0x3]  ;;  %v173_v9 = vld [vmem:[%s3221_s1 + $0x18] sm:$0xff]  ;;  %v303_v11 = vld [vmem:[%s3226_s6 + $0x8] sm:$0xff]  ;;  %2108 = vmatprep.mubr.msk.f32.mxu1 %vm184_vm2, %v172_v8 }
   0x4   :  { %2249 = vmatprep.subr.bf16.mxu0 %v2248_v3  ;;  %2336 = vmatprep.subr.msk.mxu1 %vm203_vm1, %v176_v7  ;;  %v302_v10 = vld [vmem:[%s3226_s6] sm:$0xff] }
   0x5   :  { %2251 = vmatpush3.bf16.msra.mxu0 %v2248_v3  ;;  %2337 = vmatpush3.msk.msra.mxu1 %vm203_vm1, %v176_v7  ;;  %v2256_v12 = vpack.c.bf16 %v303_v11, %v302_v10 }
   0x6   :  { %2253 = vmatprep.subr.bf16.mxu0 %v2252_v6 }
   0x7   :  { %20 = vsyncpa [#allocation3], 0  ;;  %2109 = vmatmul.mubr.msk.f32.vlgmr.msra.gmra.mrb[0].mxu1 %vm184_vm2, %v173_v9  ;;  %v394_v13 = vld [vmem:[%s3228_s8] sm:$0xff]  ;;  %v395_v14 = vld [vmem:[%s3228_s8 + $0x8] sm:$0xff]  ;;  %2257 = vmatprep.subr.bf16.mxu1 %v2256_v12  ;;  %vm473_vm3 = vcmask 130048   ;;  %v724_v62 = vlaneseq  ;;  %vm733_vm8 = vcmask 31744  }
   0x8   :  { %v76_v15 = vld [vmem:[%s3220_s0 + $0x8] sm:$0xff]  ;;  %2259 = vmatpush3.bf16.msra.mxu1 %v2256_v12  ;;  %v170_v16 = vld [vmem:[%s3221_s1] sm:$0xff]  ;;  %v2264_v17 = vpack.c.bf16 %v395_v14, %v394_v13  ;;  %v304_v19 = vld [vmem:[%s3226_s6 + $0x10] sm:$0xff]  ;;  %s2416_s18 = smov [#allocation2]  }
   0x9   :  { %2255 = vmatpush3.bf16.msra.mxu0 %v2252_v6  ;;  %v171_v18 = vld [vmem:[%s3221_s1 + $0x8] sm:$0xff]  ;;  %v305_v20 = vld [vmem:[%s3226_s6 + $0x18] sm:$0xff]  ;;  %v396_v21 = vld [vmem:[%s3228_s8 + $0x10] sm:$0xff]  ;;  %v2644_v1 = vand.u32 127, %v724_v62 }
   0xa   :  { %2103 = vmatprep.subr.msk.mxu0 %vm203_vm1, %v176_v7  ;;  %v174_v22 = vld [vmem:[%s3221_s1 + $0x20] sm:$0xff]  ;;  %v2260_v23 = vpack.c.bf16 %v305_v20, %v304_v19  ;;  %v397_v24 = vld [vmem:[%s3228_s8 + $0x18] sm:$0xff]  ;;  %v175_v25 = vld [vmem:[%s3221_s1 + $0x28] sm:$0xff] }
   0xb   :  { %2111 = vmatprep.mubr.msk.f32.mxu1 %vm184_vm2, %v174_v22  ;;  %v2268_v26 = vpack.c.bf16 %v397_v24, %v396_v21  ;;  %v1923_v27 = vld [vmem:[%s3225_s5] ss:$0 sm:$0xff]  ;;  %v2001_v45 = vld [vmem:[%s3223_s3 + $0x8] sm:$0xff]   ;;  %v2002_v49 = vld [vmem:[%s3223_s3 + $0x10] sm:$0xff]   ;;  %vm817_vm5 = vcmp.eq.s32.totalorder %v2644_v1, 1  ;;  %vm726_vm6 = vcmp.eq.s32.totalorder %v2644_v1, 0 }
   0xc   :  { %2101 = vmatmul.mubr.msk.f32.vlgmr.msra.gmra.mrb[0].mxu0 %vm88_vm0, %v76_v15  ;;  %2112 = vmatmul.mubr.msk.f32.gmra.mrb[2].mxu1 %vm184_vm2, %v175_v25  ;;  %v1988_v35 = vld [vmem:[%s3223_s3] sm:$0xff]   ;;  %v2596_v48 = vunpack.c.l.bf16 %v2001_v45  ;;  %v2603_v50 = vunpack.c.h.bf16 %v2001_v45  ;;  %v2607_v51 = vunpack.c.l.bf16 %v2002_v49  ;;  %v2614_v53 = vunpack.c.h.bf16 %v2002_v49  ;;  %v1999_v55 = vld [vmem:[%s3222_s2 + $0x8] sm:$0xff]   ;;  %v2000_v58 = vld [vmem:[%s3222_s2 + $0x10] sm:$0xff]  }
   0xd   :  { %2104 = vmatpush3.msk.msra.mxu0 %vm203_vm1, %v176_v7  ;;  %2105 = vmatprep.mubr.msk.f32.mxu0 %vm184_vm2, %v170_v16  ;;  %v2584_v36 = vunpack.c.l.bf16 %v1988_v35  ;;  %v1934_v37 = vld [vmem:[%s3227_s7] ss:$0 sm:$0xff]  ;;  %v2594_v47 = vunpack.c.h.bf16 %v1988_v35  ;;  %v1981_v57 = vunpack.c.l.bf16 %v1999_v55  ;;  %v1982_v59 = vunpack.c.h.bf16 %v1999_v55 }
   0xe   :  { %2265 = vmatprep.subr.bf16.mxu0 %v2264_v17  ;;  %2261 = vmatprep.subr.bf16.mxu1 %v2260_v23  ;;  %v1976_v52 = vld [vmem:[%s3222_s2] sm:$0xff]   ;;  %v1985_v60 = vunpack.c.l.bf16 %v2000_v58  ;;  %v1986_v61 = vunpack.c.h.bf16 %v2000_v58  ;;  %vm901_vm9 = vcmp.eq.s32.totalorder %v2644_v1, 2  ;;  %vm985_vm10 = vcmp.eq.s32.totalorder %v2644_v1, 3 }
   0xf   :  { %2263 = vmatpush3.bf16.msra.mxu1 %v2260_v23  ;;  %v1977_v54 = vunpack.c.l.bf16 %v1976_v52  ;;  %v1978_v56 = vunpack.c.h.bf16 %v1976_v52  ;;  %v2641_v63 = vld [vmem:[%s3230_s10] ss:$0 sm:$0xff]  ;;  %vm753_vm15 = vcmp.gt.f32.partialorder %v2594_v47, 0.0  ;;  %vm752_vm1 = vcmp.gt.f32.partialorder %v2584_v36, 0.0  ;;  %s1912_s10 = sshll.u32 %s2416_s18, 4  ;;  %s1913_s10 = int_to_ptr.vmem [resolvable:$true] %s1912_s10 }
  0x10   :  { %2106 = vmatmul.mubr.msk.f32.vlgmr.msra.gmra.mrb[2].mxu0 %vm184_vm2, %v171_v18  ;;  %vm755_vm2 = vcmp.gt.f32.partialorder %v2603_v50, 0.0  ;;  %s2392_s19 = scalar_lea.vmem %s1913_s10, 256  ;;  %p2397_p1 = scmp.lt.s32.totalorder %s1913_s10, %s1913_s10 }
  0x11   :  { %2267 = vmatpush3.bf16.msra.mxu0 %v2264_v17  ;;  %p2393_p0 = scmp.ne.s32.totalorder %s1913_s10, %s2392_s19  ;;  %p2398_p2 = scmp.lt.s32.totalorder %s2392_s19, %s2392_s19 }
  0x12   :  { %2269 = vmatprep.subr.bf16.mxu0 %v2268_v26 }
  0x13   :  { %p2399_p3 = por %p2398_p2, %p2397_p1 }
  0x15   :  { %2271 = vmatpush3.bf16.msra.mxu0 %v2268_v26  ;;  %p2400_p4 = pnand %p2399_p3, %p2393_p0 }
  0xdf   :  { %v2102_v28 = vpop.f32.mrb[0].mxu0 }
  0xe0   :  { %v167_v29 = vadd.f32 %v2102_v28, %v1923_v27  ;;  %v161_v30 = vpop.f32.mrb[1].mxu0 }
  0xe1   :  { %v162_v31 = vadd.f32 %v1923_v27, %v161_v30 }
  0xe3   :  { %2122 = vmatprep.mubr.msk.f32.mxu1 %vm88_vm0, %v162_v31  ;;  %2133 = vmatprep.mubr.msk.f32.mxu0 %vm88_vm0, %v162_v31  ;;  %v2107_v32 = vpop.f32.mrb[2].mxu0  ;;  %v2296_v33 = vpack.c.bf16 %v167_v29, %v162_v31 }
  0xe4   :  { %2123 = vmatmul.mubr.msk.f32.vlgmr.msra.gmra.mrb[4].mxu1 %vm88_vm0, %v167_v29  ;;  %2134 = vmatmul.mubr.msk.f32.vlgmr.msra.gmra.mrb[4].mxu0 %vm88_vm0, %v167_v29  ;;  %v273_v34 = vpop.f32.mrb[3].mxu0  ;;  %v279_v0 = vadd.f32 %v2107_v32, %v2641_v63 }
  0xe5   :  { %2140 = vmatprep.mubr.msk.f32.mxu1 %vm473_vm3, %v2584_v36  ;;  %v274_v2 = vadd.f32 %v2641_v63, %v273_v34 }
 0x1b7   :  { %v2124_v38 = vpop.f32.mrb[4].mxu1  ;;  %v2135_v39 = vpop.f32.mrb[4].mxu0 }
 0x1b8   :  { %v391_v40 = vadd.f32 %v2124_v38, %v1934_v37  ;;  %v385_v41 = vpop.f32.mrb[5].mxu1  ;;  %v464_v42 = vpop.f32.mrb[5].mxu0 }
 0x1b9   :  { %v386_v43 = vadd.f32 %v1934_v37, %v385_v41  ;;  %v2272_v44 = vpack.c.bf16 %v2135_v39, %v464_v42 }
 0x1bb   :  { %v2276_v46 = vpack.c.bf16 %v391_v40, %v386_v43  ;;  %2273 = vmatprep.subr.bf16.mxu1 %v2272_v44 }
 0x1bc   :  { %2275 = vmatpush3.bf16.msra.mxu1 %v2272_v44 }
 0x1bd   :  { %2277 = vmatprep.subr.bf16.mxu1 %v2276_v46 }
 0x1bf   :  { %2141 = vmatmul.mubr.msk.f32.vlgmr.msra.gmra.mrb[6].mxu1 %vm473_vm3, %v2594_v47 }
 0x1c0   :  { %2279 = vmatpush3.bf16.msra.mxu1 %v2276_v46  ;;  %2143 = vmatprep.mubr.msk.f32.mxu1 %vm473_vm3, %v2596_v48 }
 0x1c1   :  { %2297 = vmatprep.subr.bf16.mxu1 %v2296_v33 }
 0x1c3   :  { %2144 = vmatmul.mubr.msk.f32.gmra.mrb[0].mxu1 %vm473_vm3, %v2603_v50 }
 0x1c4   :  { %2146 = vmatprep.mubr.msk.f32.mxu1 %vm473_vm3, %v2607_v51 }
 0x1c7   :  { %2147 = vmatmul.mubr.msk.f32.gmra.mrb[2].mxu1 %vm473_vm3, %v2614_v53 }
 0x1c8   :  { %2153 = vmatprep.mubr.msk.f32.mxu1 %vm473_vm3, %v1977_v54 }
 0x1cb   :  { %2154 = vmatmul.mubr.msk.f32.vlgmr.msra.gmra.mrb[6].mxu1 %vm473_vm3, %v1978_v56 }
 0x1cc   :  { %2299 = vmatpush3.bf16.msra.mxu1 %v2296_v33  ;;  %2156 = vmatprep.mubr.msk.f32.mxu1 %vm473_vm3, %v1981_v57 }
 0x1cf   :  { %2157 = vmatmul.mubr.msk.f32.gmra.mrb[0].mxu1 %vm473_vm3, %v1982_v59 }
 0x1d0   :  { %2159 = vmatprep.mubr.msk.f32.mxu1 %vm473_vm3, %v1985_v60 }
 0x1d3   :  { %2160 = vmatmul.mubr.msk.f32.gmra.mrb[2].mxu1 %vm473_vm3, %v1986_v61 }
 0x1d4   :  { %2194 = vmatprep.mubr.msk.f32.mxu1 %vm473_vm3, %v1977_v54 }
 0x1d7   :  { %2195 = vmatmul.mubr.msk.f32.vlgmr.msra.gmra.mrb[8].mxu1 %vm473_vm3, %v1978_v56 }
 0x1d8   :  { %2197 = vmatprep.mubr.msk.f32.mxu1 %vm473_vm3, %v1981_v57 }
 0x1db   :  { %2198 = vmatmul.mubr.msk.f32.gmra.mrb[10].mxu1 %vm473_vm3, %v1982_v59 }
 0x1dc   :  { %2200 = vmatprep.mubr.msk.f32.mxu1 %vm473_vm3, %v1985_v60 }
 0x1df   :  { %2201 = vmatmul.mubr.msk.f32.gmra.mrb[12].mxu1 %vm473_vm3, %v1986_v61 }
 0x29e   :  { %v2155_v3 = vpop.f32.mrb[6].mxu1 }
 0x29f   :  { %v2339_v4 = vadd.f32 %v2155_v3, %v279_v0  ;;  %v671_v5 = vpop.f32.mrb[7].mxu1 }
 0x2a0   :  { %v2341_v6 = vadd.f32 %v671_v5, %v274_v2 }
 0x2a1   :  { %vm707_vm4 = vcmp.ge.f32.partialorder %v2339_v4, 0.0  ;;  %v713_v7 = vmul.f32 0.2, %v2339_v4 }
 0x2a2   :  { %vm706_vm7 = vcmp.ge.f32.partialorder %v2341_v6, 0.0  ;;  %v712_v8 = vmul.f32 0.2, %v2341_v6  ;;  %v2158_v9 = vpop.f32.mrb[0].mxu1 }
 0x2a3   :  { %v2649_v10 = vsel %vm707_vm4, %v2339_v4, %v713_v7  ;;  %v2342_v11 = vadd.f32 %v2158_v9, %v2641_v63  ;;  %v681_v12 = vpop.f32.mrb[1].mxu1  ;;  %vm754_vm4 = vcmp.gt.f32.partialorder %v2596_v48, 0.0 }
 0x2a4   :  { %v2653_v13 = vsel %vm706_vm7, %v2341_v6, %v712_v8  ;;  %v819_v14 = vsel %vm817_vm5, %v2649_v10, 0.0  ;;  %v728_v15 = vsel %vm726_vm6, %v2649_v10, 0.0  ;;  %v903_v19 = vsel %vm901_vm9, %v2649_v10, 0.0 }
 0x2a5   :  { %v827_v16 = vsel %vm733_vm8, %v819_v14, 0.0  ;;  %v737_v17 = vsel %vm733_vm8, %v728_v15, 0.0  ;;  %v727_v20 = vsel %vm726_vm6, %v2653_v13, 0.0  ;;  %v715_v21 = vmul.f32 0.2, %v2342_v11 }
 0x2a6   :  { %828 = vadd.xlane.f32.xlu1 %v827_v16  ;;  %738 = vadd.xlane.f32.xlu0 %v737_v17  ;;  %v2161_v18 = vpop.f32.mrb[2].mxu1  ;;  %vm709_vm11 = vcmp.ge.f32.partialorder %v2342_v11, 0.0  ;;  %v911_v23 = vsel %vm733_vm8, %v903_v19, 0.0  ;;  %v734_v24 = vsel %vm733_vm8, %v727_v20, 0.0  ;;  %v987_v25 = vsel %vm985_vm10, %v2649_v10, 0.0 }
 0x2a7   :  { %v691_v22 = vpop.f32.mrb[3].mxu1  ;;  %v818_v26 = vsel %vm817_vm5, %v2653_v13, 0.0  ;;  %v2678_v27 = vsel %vm709_vm11, %v2342_v11, %v715_v21  ;;  %v2343_v28 = vadd.f32 %v2641_v63, %v681_v12  ;;  %v995_v29 = vsel %vm733_vm8, %v987_v25, 0.0 }
 0x2a8   :  { %v824_v30 = vsel %vm733_vm8, %v818_v26, 0.0  ;;  %v902_v31 = vsel %vm901_vm9, %v2653_v13, 0.0  ;;  %v730_v32 = vsel %vm726_vm6, %v2678_v27, 0.0  ;;  %v2344_v34 = vadd.f32 %v2161_v18, %v2641_v63 }
 0x2a9   :  { %v714_v33 = vmul.f32 0.2, %v2343_v28  ;;  %vm708_vm12 = vcmp.ge.f32.partialorder %v2343_v28, 0.0  ;;  %v908_v35 = vsel %vm733_vm8, %v902_v31, 0.0  ;;  %v743_v37 = vsel %vm733_vm8, %v730_v32, 0.0 }
 0x2aa   :  { %912 = vadd.xlane.f32.xlu1 %v911_v23  ;;  %735 = vadd.xlane.f32.xlu0 %v734_v24  ;;  %v986_v38 = vsel %vm985_vm10, %v2653_v13, 0.0  ;;  %v821_v39 = vsel %vm817_vm5, %v2678_v27, 0.0  ;;  %v717_v41 = vmul.f32 0.2, %v2344_v34  ;;  %vm711_vm13 = vcmp.ge.f32.partialorder %v2344_v34, 0.0 }
 0x2ab   :  { %v2698_v40 = vsel %vm708_vm12, %v2343_v28, %v714_v33  ;;  %v992_v42 = vsel %vm733_vm8, %v986_v38, 0.0  ;;  %v833_v43 = vsel %vm733_vm8, %v821_v39, 0.0  ;;  %v905_v44 = vsel %vm901_vm9, %v2678_v27, 0.0 }
 0x2ac   :  { %v729_v45 = vsel %vm726_vm6, %v2698_v40, 0.0  ;;  %v2708_v46 = vsel %vm711_vm13, %v2344_v34, %v717_v41  ;;  %v2345_v49 = vadd.f32 %v2641_v63, %v691_v22  ;;  %v917_v52 = vsel %vm733_vm8, %v905_v44, 0.0 }
 0x2ad   :  { %v740_v54 = vsel %vm733_vm8, %v729_v45, 0.0  ;;  %v820_v55 = vsel %vm817_vm5, %v2698_v40, 0.0  ;;  %v732_v56 = vsel %vm726_vm6, %v2708_v46, 0.0  ;;  %v904_v60 = vsel %vm901_vm9, %v2698_v40, 0.0 }
 0x2ae   :  { %996 = vadd.xlane.f32.xlu1 %v995_v29  ;;  %825 = vadd.xlane.f32.xlu0 %v824_v30  ;;  %v716_v57 = vmul.f32 0.2, %v2345_v49  ;;  %vm710_vm14 = vcmp.ge.f32.partialorder %v2345_v49, 0.0  ;;  %v830_v58 = vsel %vm733_vm8, %v820_v55, 0.0  ;;  %v749_v59 = vsel %vm733_vm8, %v732_v56, 0.0 }
 0x2af   :  { %v823_v61 = vsel %vm817_vm5, %v2708_v46, 0.0  ;;  %v914_v63 = vsel %vm733_vm8, %v904_v60, 0.0  ;;  %v907_v2 = vsel %vm901_vm9, %v2708_v46, 0.0  ;;  %v991_v12 = vsel %vm985_vm10, %v2708_v46, 0.0 }
 0x2b0   :  { %v2727_v62 = vsel %vm710_vm14, %v2345_v49, %v716_v57  ;;  %v839_v0 = vsel %vm733_vm8, %v823_v61, 0.0  ;;  %v923_v4 = vsel %vm733_vm8, %v907_v2, 0.0  ;;  %v1007_v15 = vsel %vm733_vm8, %v991_v12, 0.0 }
 0x2b1   :  { %v822_v3 = vsel %vm817_vm5, %v2727_v62, 0.0  ;;  %v906_v6 = vsel %vm901_vm9, %v2727_v62, 0.0  ;;  %v731_v7 = vsel %vm726_vm6, %v2727_v62, 0.0  ;;  %v990_v11 = vsel %vm985_vm10, %v2727_v62, 0.0 }
 0x2b2   :  { %909 = vadd.xlane.f32.xlu0 %v908_v35  ;;  %744 = vadd.xlane.f32.xlu1 %v743_v37  ;;  %v836_v5 = vsel %vm733_vm8, %v822_v3, 0.0  ;;  %v920_v8 = vsel %vm733_vm8, %v906_v6, 0.0  ;;  %v746_v9 = vsel %vm733_vm8, %v731_v7, 0.0  ;;  %v1004_v14 = vsel %vm733_vm8, %v990_v11, 0.0 }
 0x2b3   :  { %v988_v16 = vsel %vm985_vm10, %v2698_v40, 0.0  ;;  %v989_v17 = vsel %vm985_vm10, %v2678_v27, 0.0  ;;  %vm757_vm7 = vcmp.gt.f32.partialorder %v2614_v53, 0.0  ;;  %vm756_vm11 = vcmp.gt.f32.partialorder %v2607_v51, 0.0 }
 0x2b4   :  { %v998_v18 = vsel %vm733_vm8, %v988_v16, 0.0  ;;  %v1001_v19 = vsel %vm733_vm8, %v989_v17, 0.0  ;;  %vm1119_vm12 = vcmask 392192   ;;  %vm1823_vm13 = vcmask 523264  }
 0x2b6   :  { %993 = vadd.xlane.f32.xlu0 %v992_v42  ;;  %834 = vadd.xlane.f32.xlu1 %v833_v43 }
 0x2ba   :  { %918 = vadd.xlane.f32.xlu1 %v917_v52  ;;  %741 = vadd.xlane.f32.xlu0 %v740_v54 }
 0x2be   :  { %831 = vadd.xlane.f32.xlu0 %v830_v58  ;;  %750 = vadd.xlane.f32.xlu1 %v749_v59 }
 0x2c2   :  { %915 = vadd.xlane.f32.xlu0 %v914_v63  ;;  %840 = vadd.xlane.f32.xlu1 %v839_v0 }
 0x2c6   :  { %924 = vadd.xlane.f32.xlu1 %v923_v4  ;;  %837 = vadd.xlane.f32.xlu0 %v836_v5 }
 0x2ca   :  { %921 = vadd.xlane.f32.xlu0 %v920_v8  ;;  %747 = vadd.xlane.f32.xlu1 %v746_v9 }
 0x2ce   :  { %1005 = vadd.xlane.f32.xlu0 %v1004_v14  ;;  %1008 = vadd.xlane.f32.xlu1 %v1007_v15 }
 0x2d2   :  { %999 = vadd.xlane.f32.xlu0 %v998_v18  ;;  %1002 = vadd.xlane.f32.xlu1 %v1001_v19 }
 0x333   :  { %v829_v20 = vpop.xlane.xlu1 %828  ;;  %v739_v21 = vpop.xlane.xlu0 %738 }
 0x334   :  { %v843_v35 = vsel %vm753_vm15, %v829_v20, -1e+30  ;;  %v759_v37 = vsel %vm753_vm15, %v739_v21, -1e+30 }
 0x335   :  { %v849_v42 = vsel %vm473_vm3, %v843_v35, -inf  ;;  %v765_v45 = vsel %vm473_vm3, %v759_v37, -inf }
 0x337   :  { %v913_v22 = vpop.xlane.xlu1 %912  ;;  %v736_v23 = vpop.xlane.xlu0 %735 }
 0x338   :  { %v927_v38 = vsel %vm753_vm15, %v913_v22, -1e+30  ;;  %v758_v43 = vsel %vm752_vm1, %v736_v23, -1e+30 }
 0x339   :  { %v933_v49 = vsel %vm473_vm3, %v927_v38, -inf  ;;  %v764_v58 = vsel %vm473_vm3, %v758_v43, -inf }
 0x33b   :  { %v2763_v24 = vpop.xlane.xlu1 %996  ;;  %v826_v25 = vpop.xlane.xlu0 %825 }
 0x33c   :  { %v842_v52 = vsel %vm752_vm1, %v826_v25, -1e+30  ;;  %v1011_v38 = vsel %vm753_vm15, %v2763_v24, -1e+30 }
 0x33d   :  { %v848_v2 = vsel %vm473_vm3, %v842_v52, -inf }
 0x33f   :  { %v910_v26 = vpop.xlane.xlu0 %909  ;;  %v745_v28 = vpop.xlane.xlu1 %744 }
 0x340   :  { %v926_v55 = vsel %vm752_vm1, %v910_v26, -1e+30  ;;  %v761_v56 = vsel %vm755_vm2, %v745_v28, -1e+30 }
 0x341   :  { %v932_v6 = vsel %vm473_vm3, %v926_v55, -inf  ;;  %v767_v16 = vsel %vm473_vm3, %v761_v56, -inf }
 0x343   :  { %v2765_v29 = vpop.xlane.xlu0 %993  ;;  %v835_v30 = vpop.xlane.xlu1 %834 }
 0x344   :  { %v845_v57 = vsel %vm755_vm2, %v835_v30, -1e+30 }
 0x345   :  { %v851_v7 = vsel %vm473_vm3, %v845_v57, -inf }
 0x347   :  { %v919_v31 = vpop.xlane.xlu1 %918  ;;  %v742_v32 = vpop.xlane.xlu0 %741 }
 0x348   :  { %v760_v59 = vsel %vm754_vm4, %v742_v32, -1e+30  ;;  %v929_v11 = vsel %vm755_vm2, %v919_v31, -1e+30 }
 0x349   :  { %v766_v17 = vsel %vm473_vm3, %v760_v59, -inf  ;;  %v935_v28 = vsel %vm473_vm3, %v929_v11, -inf  ;;  %v1017_v59 = vsel %vm473_vm3, %v1011_v38, -inf }
 0x34b   :  { %v832_v33 = vpop.xlane.xlu0 %831  ;;  %v751_v34 = vpop.xlane.xlu1 %750 }
 0x34c   :  { %v844_v54 = vsel %vm754_vm4, %v832_v33, -1e+30  ;;  %v763_v60 = vsel %vm757_vm7, %v751_v34, -1e+30 }
 0x34d   :  { %v850_v3 = vsel %vm473_vm3, %v844_v54, -inf  ;;  %v770_v12 = vsel %vm473_vm3, %v763_v60, -inf }
 0x34e   :  { %v857_v18 = vmax.f32 %v850_v3, %v851_v7  ;;  %v771_v30 = vmax.f32 %v765_v45, %v770_v12 }
 0x34f   :  { %v916_v39 = vpop.xlane.xlu0 %915  ;;  %v841_v41 = vpop.xlane.xlu1 %840 }
 0x350   :  { %v847_v44 = vsel %vm757_vm7, %v841_v41, -1e+30  ;;  %v928_v8 = vsel %vm754_vm4, %v916_v39, -1e+30  ;;  %v1010_v39 = vsel %vm752_vm1, %v2765_v29, -1e+30  ;;  %v773_v41 = vmax.f32 %v766_v17, %v767_v16 }
 0x351   :  { %v854_v61 = vsel %vm473_vm3, %v847_v44, -inf  ;;  %v934_v22 = vsel %vm473_vm3, %v928_v8, -inf  ;;  %v1016_v24 = vsel %vm473_vm3, %v1010_v39, -inf }
 0x352   :  { %v855_v14 = vmax.f32 %v849_v42, %v854_v61  ;;  %v941_v42 = vmax.f32 %v934_v22, %v935_v28 }
 0x353   :  { %v925_v63 = vpop.xlane.xlu1 %924  ;;  %v838_v0 = vpop.xlane.xlu0 %837 }
 0x354   :  { %v931_v4 = vsel %vm757_vm7, %v925_v63, -1e+30  ;;  %v846_v5 = vsel %vm756_vm11, %v838_v0, -1e+30 }
 0x355   :  { %v852_v9 = vsel %vm473_vm3, %v846_v5, -inf  ;;  %v938_v19 = vsel %vm473_vm3, %v931_v4, -inf }
 0x356   :  { %v853_v15 = vmax.f32 %v848_v2, %v852_v9  ;;  %v939_v33 = vmax.f32 %v933_v49, %v938_v19 }
 0x357   :  { %v922_v20 = vpop.xlane.xlu0 %921  ;;  %v748_v21 = vpop.xlane.xlu1 %747 }
 0x358   :  { %v856_v23 = vmax.f32 %v853_v15, %v855_v14  ;;  %v930_v25 = vsel %vm756_vm11, %v922_v20, -1e+30  ;;  %v762_v26 = vsel %vm756_vm11, %v748_v21, -1e+30 }
 0x359   :  { %v936_v31 = vsel %vm473_vm3, %v930_v25, -inf  ;;  %v768_v32 = vsel %vm473_vm3, %v762_v26, -inf }
 0x35a   :  { %v858_v34 = vmax.f32 %v856_v23, %v857_v18  ;;  %v937_v35 = vmax.f32 %v932_v6, %v936_v31  ;;  %v769_v37 = vmax.f32 %v764_v58, %v768_v32 }
 0x35b   :  { %v1006_v43 = vpop.xlane.xlu0 %1005  ;;  %v1009_v44 = vpop.xlane.xlu1 %1008 }
 0x35c   :  { %v859_v45 = vrot.slane %v858_v34, 4  ;;  %v940_v52 = vmax.f32 %v937_v35, %v939_v33  ;;  %v772_v54 = vmax.f32 %v769_v37, %v771_v30  ;;  %v1014_v49 = vsel %vm756_vm11, %v1006_v43, -1e+30 }
 0x35d   :  { %v1020_v55 = vsel %vm473_vm3, %v1014_v49, -inf  ;;  %v1015_v56 = vsel %vm757_vm7, %v1009_v44, -1e+30 }
 0x35e   :  { %v860_v57 = vmax.f32 %v858_v34, %v859_v45  ;;  %v942_v58 = vmax.f32 %v940_v52, %v941_v42  ;;  %v774_v29 = vmax.f32 %v772_v54, %v773_v41  ;;  %v1021_v60 = vmax.f32 %v1016_v24, %v1020_v55 }
 0x35f   :  { %v1022_v61 = vsel %vm473_vm3, %v1015_v56, -inf  ;;  %v1000_v63 = vpop.xlane.xlu0 %999  ;;  %v1003_v0 = vpop.xlane.xlu1 %1002 }
 0x360   :  { %v861_v2 = vrot.slane %v860_v57, 2  ;;  %v943_v3 = vrot.slane %v942_v58, 4  ;;  %v775_v4 = vrot.slane %v774_v29, 4  ;;  %v1023_v5 = vmax.f32 %v1017_v59, %v1022_v61 }
 0x361   :  { %v1012_v6 = vsel %vm754_vm4, %v1000_v63, -1e+30  ;;  %v1013_v7 = vsel %vm755_vm2, %v1003_v0, -1e+30 }
 0x362   :  { %v862_v8 = vmax.f32 %v860_v57, %v861_v2  ;;  %v944_v9 = vmax.f32 %v942_v58, %v943_v3  ;;  %v776_v11 = vmax.f32 %v774_v29, %v775_v4  ;;  %v1018_v12 = vsel %vm473_vm3, %v1012_v6, -inf }
 0x363   :  { %v1019_v14 = vsel %vm473_vm3, %v1013_v7, -inf  ;;  %v1024_v17 = vmax.f32 %v1021_v60, %v1023_v5 }
 0x364   :  { %v945_v15 = vrot.slane %v944_v9, 2  ;;  %v777_v16 = vrot.slane %v776_v11, 2  ;;  %v1025_v18 = vmax.f32 %v1018_v12, %v1019_v14  ;;  %v863_v19 = vrot.slane %v862_v8, 1 }
 0x366   :  { %v946_v20 = vmax.f32 %v944_v9, %v945_v15  ;;  %v778_v21 = vmax.f32 %v776_v11, %v777_v16  ;;  %v1026_v22 = vmax.f32 %v1024_v17, %v1025_v18  ;;  %v864_v26 = vmax.f32 %v862_v8, %v863_v19 }
 0x368   :  { %v779_v23 = vrot.slane %v778_v21, 1  ;;  %v1027_v25 = vrot.slane %v1026_v22, 4  ;;  %v947_v28 = vrot.slane %v946_v20, 1  ;;  %v866_v34 = vmul.f32 %v2594_v47, %v864_v26 }
 0x369   :  { %v865_v35 = vmul.f32 %v2584_v36, %v864_v26  ;;  %v868_v57 = vmul.f32 %v2603_v50, %v864_v26  ;;  %v867_v60 = vmul.f32 %v2596_v48, %v864_v26  ;;  %v870_v15 = vmul.f32 %v2614_v53, %v864_v26 }
 0x36a   :  { %v780_v30 = vmax.f32 %v778_v21, %v779_v23  ;;  %v1028_v31 = vmax.f32 %v1026_v22, %v1027_v25  ;;  %v948_v37 = vmax.f32 %v946_v20, %v947_v28  ;;  %v874_v42 = vsel %vm473_vm3, %v866_v34, 0.0 }
 0x36b   :  { %v871_v44 = vsel %vm473_vm3, %v865_v35, 0.0  ;;  %v880_v61 = vsel %vm473_vm3, %v868_v57, 0.0  ;;  %v877_v63 = vsel %vm473_vm3, %v867_v60, 0.0  ;;  %v869_v16 = vmul.f32 %v2607_v51, %v864_v26 }
 0x36c   :  { %v782_v32 = vmul.f32 %v2594_v47, %v780_v30  ;;  %v781_v33 = vmul.f32 %v2584_v36, %v780_v30  ;;  %v1029_v38 = vrot.slane %v1028_v31, 2  ;;  %v950_v45 = vmul.f32 %v2594_v47, %v948_v37 }
 0x36d   :  { %v949_v52 = vmul.f32 %v2584_v36, %v948_v37  ;;  %v784_v54 = vmul.f32 %v2603_v50, %v780_v30  ;;  %v783_v24 = vmul.f32 %v2596_v48, %v780_v30  ;;  %v952_v5 = vmul.f32 %v2603_v50, %v948_v37 }
 0x36e   :  { %v790_v39 = vsel %vm473_vm3, %v782_v32, 0.0  ;;  %v787_v41 = vsel %vm473_vm3, %v781_v33, 0.0  ;;  %v1030_v43 = vmax.f32 %v1028_v31, %v1029_v38  ;;  %v958_v55 = vsel %vm473_vm3, %v950_v45, 0.0 }
 0x36f   :  { %791 = vadd.xlane.f32.xlu1 %v790_v39  ;;  %788 = vadd.xlane.f32.xlu0 %v787_v41  ;;  %v955_v56 = vsel %vm473_vm3, %v949_v52, 0.0  ;;  %v796_v29 = vsel %vm473_vm3, %v784_v54, 0.0  ;;  %v793_v59 = vsel %vm473_vm3, %v783_v24, 0.0  ;;  %v951_v6 = vmul.f32 %v2596_v48, %v948_v37 }
 0x370   :  { %v1031_v49 = vrot.slane %v1030_v43, 1  ;;  %v964_v7 = vsel %vm473_vm3, %v952_v5, 0.0  ;;  %v786_v9 = vmul.f32 %v2614_v53, %v780_v30  ;;  %v785_v11 = vmul.f32 %v2607_v51, %v780_v30 }
 0x371   :  { %v961_v8 = vsel %vm473_vm3, %v951_v6, 0.0  ;;  %v886_v17 = vsel %vm473_vm3, %v870_v15, 0.0  ;;  %v883_v18 = vsel %vm473_vm3, %v869_v16, 0.0  ;;  %v954_v23 = vmul.f32 %v2614_v53, %v948_v37 }
 0x372   :  { %v1032_v58 = vmax.f32 %v1030_v43, %v1031_v49  ;;  %v802_v12 = vsel %vm473_vm3, %v786_v9, 0.0  ;;  %v799_v14 = vsel %vm473_vm3, %v785_v11, 0.0  ;;  %v953_v25 = vmul.f32 %v2607_v51, %v948_v37 }
 0x373   :  { %875 = vadd.xlane.f32.xlu1 %v874_v42  ;;  %872 = vadd.xlane.f32.xlu0 %v871_v44  ;;  %v970_v26 = vsel %vm473_vm3, %v954_v23, 0.0 }
 0x374   :  { %v1034_v0 = vmul.f32 %v2594_v47, %v1032_v58  ;;  %v1033_v2 = vmul.f32 %v2584_v36, %v1032_v58  ;;  %v1036_v19 = vmul.f32 %v2603_v50, %v1032_v58  ;;  %v1035_v20 = vmul.f32 %v2596_v48, %v1032_v58 }
 0x375   :  { %v967_v28 = vsel %vm473_vm3, %v953_v25, 0.0  ;;  %v1038_v30 = vmul.f32 %v2614_v53, %v1032_v58  ;;  %v1037_v31 = vmul.f32 %v2607_v51, %v1032_v58 }
 0x376   :  { %v1042_v3 = vsel %vm473_vm3, %v1034_v0, 0.0  ;;  %v1039_v4 = vsel %vm473_vm3, %v1033_v2, 0.0  ;;  %v1048_v21 = vsel %vm473_vm3, %v1036_v19, 0.0  ;;  %v1045_v22 = vsel %vm473_vm3, %v1035_v20, 0.0 }
 0x377   :  { %959 = vadd.xlane.f32.xlu1 %v958_v55  ;;  %956 = vadd.xlane.f32.xlu0 %v955_v56  ;;  %v1054_v32 = vsel %vm473_vm3, %v1038_v30, 0.0  ;;  %v1051_v33 = vsel %vm473_vm3, %v1037_v31, 0.0 }
 0x37b   :  { %797 = vadd.xlane.f32.xlu1 %v796_v29  ;;  %794 = vadd.xlane.f32.xlu0 %v793_v59 }
 0x37f   :  { %881 = vadd.xlane.f32.xlu1 %v880_v61  ;;  %878 = vadd.xlane.f32.xlu0 %v877_v63 }
 0x383   :  { %1043 = vadd.xlane.f32.xlu1 %v1042_v3  ;;  %1040 = vadd.xlane.f32.xlu0 %v1039_v4 }
 0x387   :  { %965 = vadd.xlane.f32.xlu1 %v964_v7  ;;  %962 = vadd.xlane.f32.xlu0 %v961_v8 }
 0x38b   :  { %803 = vadd.xlane.f32.xlu1 %v802_v12  ;;  %800 = vadd.xlane.f32.xlu0 %v799_v14 }
 0x38f   :  { %887 = vadd.xlane.f32.xlu1 %v886_v17  ;;  %884 = vadd.xlane.f32.xlu0 %v883_v18 }
 0x393   :  { %1049 = vadd.xlane.f32.xlu1 %v1048_v21  ;;  %1046 = vadd.xlane.f32.xlu0 %v1045_v22 }
 0x397   :  { %971 = vadd.xlane.f32.xlu1 %v970_v26  ;;  %968 = vadd.xlane.f32.xlu0 %v967_v28 }
 0x39b   :  { %1055 = vadd.xlane.f32.xlu1 %v1054_v32  ;;  %1052 = vadd.xlane.f32.xlu0 %v1051_v33 }
 0x3c8   :  { %1087 = vxpose.xlu0.b32.start [1/6] (short) (narrow) %v2584_v36, 16 }
 0x3cc   :  { %1088 = vxpose.xlu0.b32.cont [2/6] (short) (narrow) %v2594_v47, 16 }
 0x3d0   :  { %1089 = vxpose.xlu0.b32.cont [3/6] (short) (narrow) %v2596_v48, 16 }
 0x3d4   :  { %1090 = vxpose.xlu0.b32.cont [4/6] (short) (narrow) %v2603_v50, 16 }
 0x3d8   :  { %1091 = vxpose.xlu0.b32.cont [5/6] (short) (narrow) %v2607_v51, 16 }
 0x3dc   :  { %1092 = vxpose.xlu0.b32.end [6/6] (short) (narrow) %v2614_v53, 16 }
 0x3fc   :  { %v789_v34 = vpop.xlane.xlu0 %788  ;;  %v792_v35 = vpop.xlane.xlu1 %791 }
 0x3fd   :  { %v805_v49 = vsel %vm726_vm6, %v789_v34, 0.0  ;;  %v806_v55 = vsel %vm726_vm6, %v792_v35, 0.0 }
 0x400   :  { %v873_v37 = vpop.xlane.xlu0 %872  ;;  %v876_v38 = vpop.xlane.xlu1 %875 }
 0x401   :  { %v889_v44 = vsel %vm817_vm5, %v873_v37, 0.0  ;;  %v890_v45 = vsel %vm817_vm5, %v876_v38, 0.0 }
 0x402   :  { %v895_v57 = vadd.f32 %v889_v44, %v805_v49  ;;  %v896_v58 = vadd.f32 %v890_v45, %v806_v55 }
 0x404   :  { %v957_v39 = vpop.xlane.xlu0 %956  ;;  %v960_v41 = vpop.xlane.xlu1 %959 }
 0x405   :  { %v973_v56 = vsel %vm901_vm9, %v957_v39, 0.0  ;;  %v974_v24 = vsel %vm901_vm9, %v960_v41, 0.0 }
 0x406   :  { %v979_v29 = vadd.f32 %v973_v56, %v895_v57  ;;  %v980_v59 = vadd.f32 %v974_v24, %v896_v58 }
 0x408   :  { %v795_v42 = vpop.xlane.xlu0 %794  ;;  %v798_v43 = vpop.xlane.xlu1 %797 }
 0x40c   :  { %v879_v52 = vpop.xlane.xlu0 %878  ;;  %v882_v54 = vpop.xlane.xlu1 %881 }
 0x40d   :  { %v891_v14 = vsel %vm817_vm5, %v879_v52, 0.0  ;;  %v892_v15 = vsel %vm817_vm5, %v882_v54, 0.0 }
 0x410   :  { %v1041_v60 = vpop.xlane.xlu0 %1040  ;;  %v1044_v61 = vpop.xlane.xlu1 %1043 }
 0x411   :  { %v1057_v63 = vsel %vm985_vm10, %v1041_v60, 0.0  ;;  %v1058_v0 = vsel %vm985_vm10, %v1044_v61, 0.0 }
 0x412   :  { %v1063_v2 = vadd.f32 %v1057_v63, %v979_v29  ;;  %v1064_v3 = vadd.f32 %v1058_v0, %v980_v59 }
 0x414   :  { %v1069_v4 = vsub.f32 %v2653_v13, %v1063_v2  ;;  %v1070_v5 = vsub.f32 %v2649_v10, %v1064_v3  ;;  %v963_v6 = vpop.xlane.xlu0 %962  ;;  %v966_v7 = vpop.xlane.xlu1 %965  ;;  %v807_v13 = vsel %vm726_vm6, %v795_v42, 0.0  ;;  %v808_v10 = vsel %vm726_vm6, %v798_v43, 0.0 }
 0x415   :  { %v975_v18 = vsel %vm901_vm9, %v963_v6, 0.0  ;;  %v976_v19 = vsel %vm901_vm9, %v966_v7, 0.0  ;;  %v897_v20 = vadd.f32 %v891_v14, %v807_v13  ;;  %v898_v21 = vadd.f32 %v892_v15, %v808_v10 }
 0x416   :  { %v1075_v8 = vmul.f32 1.442695, %v1069_v4  ;;  %v1077_v9 = vmul.f32 1.442695, %v1070_v5 }
 0x417   :  { %v981_v22 = vadd.f32 %v975_v18, %v897_v20  ;;  %v982_v23 = vadd.f32 %v976_v19, %v898_v21 }
 0x418   :  { %2360 = vpow2.f32 %v1075_v8  ;;  %v801_v11 = vpop.xlane.xlu0 %800  ;;  %v804_v12 = vpop.xlane.xlu1 %803 }
 0x419   :  { %2362 = vpow2.f32 %v1077_v9  ;;  %v809_v44 = vsel %vm726_vm6, %v801_v11, 0.0  ;;  %v810_v45 = vsel %vm726_vm6, %v804_v12, 0.0 }
 0x41c   :  { %v885_v16 = vpop.xlane.xlu0 %884  ;;  %v888_v17 = vpop.xlane.xlu1 %887 }
 0x41d   :  { %v893_v35 = vsel %vm817_vm5, %v885_v16, 0.0  ;;  %v894_v37 = vsel %vm817_vm5, %v888_v17, 0.0 }
 0x41e   :  { %v900_v49 = vadd.f32 %v894_v37, %v810_v45 }
 0x420   :  { %v1047_v25 = vpop.xlane.xlu0 %1046  ;;  %v1050_v26 = vpop.xlane.xlu1 %1049 }
 0x421   :  { %v1059_v28 = vsel %vm985_vm10, %v1047_v25, 0.0  ;;  %v1060_v30 = vsel %vm985_vm10, %v1050_v26, 0.0 }
 0x422   :  { %v2935_v31 = vpop.eup %2360  ;;  %v1065_v32 = vadd.f32 %v1059_v28, %v981_v22  ;;  %v1066_v33 = vadd.f32 %v1060_v30, %v982_v23 }
 0x423   :  { %v2937_v34 = vpop.eup %2362 }
 0x424   :  { %v1071_v38 = vsub.f32 %v2698_v40, %v1065_v32  ;;  %v1072_v39 = vsub.f32 %v2678_v27, %v1066_v33  ;;  %v969_v41 = vpop.xlane.xlu0 %968  ;;  %v972_v42 = vpop.xlane.xlu1 %971  ;;  %v2280_v43 = vpack.c.bf16 %v2937_v34, %v2935_v31  ;;  %v899_v40 = vadd.f32 %v893_v35, %v809_v44 }
 0x425   :  { %v977_v52 = vsel %vm901_vm9, %v969_v41, 0.0  ;;  %v978_v54 = vsel %vm901_vm9, %v972_v42, 0.0  ;;  %v3021_v44 = vpop.f32.mrb[8].mxu1 }
 0x426   :  { %v1079_v27 = vmul.f32 1.442695, %v1071_v38  ;;  %v1081_v55 = vmul.f32 1.442695, %v1072_v39  ;;  %2281 = vmatprep.subr.bf16.mxu0 %v2280_v43  ;;  %v983_v56 = vadd.f32 %v977_v52, %v899_v40  ;;  %v984_v24 = vadd.f32 %v978_v54, %v900_v49 }
 0x427   :  { %2283 = vmatpush3.bf16.msra.mxu0 %v2280_v43 }
 0x428   :  { %2364 = vpow2.f32 %v1079_v27  ;;  %v1053_v57 = vpop.xlane.xlu0 %1052  ;;  %v1056_v58 = vpop.xlane.xlu1 %1055 }
 0x429   :  { %2366 = vpow2.f32 %v1081_v55  ;;  %v1061_v29 = vsel %vm985_vm10, %v1053_v57, 0.0  ;;  %v1062_v59 = vsel %vm985_vm10, %v1056_v58, 0.0  ;;  %v3036_v58 = vpop.f32.mrb[9].mxu1 }
 0x42a   :  { %v1067_v60 = vadd.f32 %v1061_v29, %v983_v56  ;;  %v1068_v61 = vadd.f32 %v1062_v59, %v984_v24 }
 0x42c   :  { %v1073_v63 = vsub.f32 %v2727_v62, %v1067_v60  ;;  %v1074_v0 = vsub.f32 %v2708_v46, %v1068_v61 }
 0x42e   :  { %v1083_v2 = vmul.f32 1.442695, %v1073_v63  ;;  %v1085_v3 = vmul.f32 1.442695, %v1074_v0 }
 0x430   :  { %2368 = vpow2.f32 %v1083_v2 }
 0x431   :  { %2370 = vpow2.f32 %v1085_v3 }
 0x432   :  { %v2961_v4 = vpop.eup %2364 }
 0x433   :  { %v2963_v5 = vpop.eup %2366 }
 0x434   :  { %v2284_v6 = vpack.c.bf16 %v2963_v5, %v2961_v4 }
 0x436   :  { %2285 = vmatprep.subr.bf16.mxu0 %v2284_v6 }
 0x437   :  { %2287 = vmatpush3.bf16.msra.mxu0 %v2284_v6 }
 0x43a   :  { %v2967_v7 = vpop.eup %2368 }
 0x43b   :  { %v2371_v8 = vpop.eup %2370 }
 0x43c   :  { %v2288_v62 = vpack.c.bf16 %v2371_v8, %v2967_v7 }
 0x43e   :  { %2289 = vmatprep.subr.bf16.mxu0 %v2288_v62 }
 0x43f   :  { %2291 = vmatpush3.bf16.msra.mxu0 %v2288_v62 }
 0x448   :  { %v1103_v46 = vpop.trf.xlu0 }
 0x449   :  { %2174 = vmatprep.mubr.msk.f32.mxu0 %vm1119_vm12, %v1103_v46 }
 0x44c   :  { %v2971_v9 = vpop.trf.xlu0 }
 0x44d   :  { %2175 = vmatmul.mubr.msk.f32.vlgmr.msra.gmra.mrb[6].mxu0 %vm1119_vm12, %v2971_v9 }
 0x44e   :  { %2181 = vmatprep.mubr.msk.f32.mxu0 %vm473_vm3, %v2584_v36 }
 0x520   :  { %v2176_v11 = vpop.f32.mrb[6].mxu0 }
 0x521   :  { %v1192_v12 = vpop.f32.mrb[7].mxu0 }
 0x522   :  { %v2292_v14 = vpack.c.bf16 %v2176_v11, %v1192_v12 }
 0x524   :  { %2293 = vmatprep.subr.bf16.mxu0 %v2292_v14 }
 0x525   :  { %2295 = vmatpush3.bf16.msra.mxu0 %v2292_v14 }
 0x528   :  { %2182 = vmatmul.mubr.msk.f32.vlgmr.msra.gmra.mrb[8].mxu0 %vm473_vm3, %v2594_v47 }
 0x529   :  { %2184 = vmatprep.mubr.msk.f32.mxu0 %vm473_vm3, %v2596_v48 }
 0x52c   :  { %2185 = vmatmul.mubr.msk.f32.gmra.mrb[10].mxu0 %vm473_vm3, %v2603_v50 }
 0x52d   :  { %2187 = vmatprep.mubr.msk.f32.mxu0 %vm473_vm3, %v2607_v51 }
 0x530   :  { %2188 = vmatmul.mubr.msk.f32.gmra.mrb[12].mxu0 %vm473_vm3, %v2614_v53 }
 0x531   :  { %2215 = vmatprep.mubr.msk.f32.mxu0 %vm1119_vm12, %v1103_v46 }
 0x5fb   :  { %v2183_v36 = vpop.f32.mrb[8].mxu0 }
 0x5fc   :  { %2372 = vrcp.f32 %v2183_v36  ;;  %v1267_v15 = vpop.f32.mrb[9].mxu0 }
 0x5ff   :  { %v2186_v16 = vpop.f32.mrb[10].mxu0 }
 0x600   :  { %v1277_v17 = vpop.f32.mrb[11].mxu0 }
 0x603   :  { %v2189_v47 = vpop.f32.mrb[12].mxu0 }
 0x604   :  { %2374 = vrcp.f32 %v2189_v47  ;;  %v1287_v13 = vpop.f32.mrb[13].mxu0 }
 0x605   :  { %2376 = vrcp.f32 %v1267_v15  ;;  %v3065_v15 = vpop.f32.mrb[10].mxu1 }
 0x606   :  { %v2373_v48 = vpop.eup %2372  ;;  %2378 = vrcp.f32 %v2186_v16  ;;  %v3069_v16 = vpop.f32.mrb[11].mxu1 }
 0x607   :  { %v1303_v50 = vmul.f32 %v2373_v48, %v2937_v34  ;;  %2380 = vrcp.f32 %v1277_v17 }
 0x608   :  { %2382 = vrcp.f32 %v1287_v13 }
 0x609   :  { %v1416_v51 = vsel %vm726_vm6, %v1303_v50, 0.0  ;;  %v1453_v53 = vsel %vm817_vm5, %v1303_v50, 0.0  ;;  %v1490_v20 = vsel %vm901_vm9, %v1303_v50, 0.0  ;;  %v1527_v28 = vsel %vm985_vm10, %v1303_v50, 0.0 }
 0x60a   :  { %v1424_v10 = vsel %vm733_vm8, %v1416_v51, 0.0  ;;  %v1461_v19 = vsel %vm733_vm8, %v1453_v53, 0.0  ;;  %v1498_v25 = vsel %vm733_vm8, %v1490_v20, 0.0  ;;  %v1535_v32 = vsel %vm733_vm8, %v1527_v28, 0.0  ;;  %v3079_v51 = vpop.f32.mrb[12].mxu1 }
 0x60b   :  { %1425 = vadd.xlane.f32.xlu1 %v1424_v10  ;;  %v3081_v10 = vpop.f32.mrb[13].mxu1 }
 0x60e   :  { %v2375_v18 = vpop.eup %2374 }
 0x60f   :  { %1462 = vadd.xlane.f32.xlu1 %v1461_v19  ;;  %v2997_v21 = vmul.f32 %v2375_v18, %v2371_v8  ;;  %v2377_v22 = vpop.eup %2376 }
 0x610   :  { %v1302_v30 = vmul.f32 %v2377_v22, %v2935_v31  ;;  %v2379_v31 = vpop.eup %2378  ;;  %v3084_v22 = vand.u32 3, %v2644_v1 }
 0x611   :  { %v1457_v23 = vsel %vm817_vm5, %v2997_v21, 0.0  ;;  %v1305_v42 = vmul.f32 %v2379_v31, %v2963_v5  ;;  %v2381_v40 = vpop.eup %2380  ;;  %v1420_v63 = vsel %vm726_vm6, %v2997_v21, 0.0  ;;  %v1494_v8 = vsel %vm901_vm9, %v2997_v21, 0.0 }
 0x612   :  { %v1473_v26 = vsel %vm733_vm8, %v1457_v23, 0.0  ;;  %v1415_v33 = vsel %vm726_vm6, %v1302_v30, 0.0  ;;  %v1452_v35 = vsel %vm817_vm5, %v1302_v30, 0.0  ;;  %v1489_v38 = vsel %vm901_vm9, %v1302_v30, 0.0  ;;  %v2383_v5 = vpop.eup %2382 }
 0x613   :  { %1499 = vadd.xlane.f32.xlu1 %v1498_v25  ;;  %1474 = vadd.xlane.f32.xlu0 %v1473_v26  ;;  %v1421_v34 = vsel %vm733_vm8, %v1415_v33, 0.0  ;;  %v1458_v37 = vsel %vm733_vm8, %v1452_v35, 0.0  ;;  %v1495_v39 = vsel %vm733_vm8, %v1489_v38, 0.0  ;;  %v1526_v41 = vsel %vm985_vm10, %v1302_v30, 0.0 }
 0x614   :  { %v1532_v43 = vsel %vm733_vm8, %v1526_v41, 0.0  ;;  %v1418_v45 = vsel %vm726_vm6, %v1305_v42, 0.0  ;;  %v1455_v54 = vsel %vm817_vm5, %v1305_v42, 0.0  ;;  %v1492_v27 = vsel %vm901_vm9, %v1305_v42, 0.0 }
 0x615   :  { %v1430_v52 = vsel %vm733_vm8, %v1418_v45, 0.0  ;;  %v1467_v49 = vsel %vm733_vm8, %v1455_v54, 0.0  ;;  %v1304_v55 = vmul.f32 %v2381_v40, %v2961_v4  ;;  %v1504_v56 = vsel %vm733_vm8, %v1492_v27, 0.0 }
 0x616   :  { %v1436_v0 = vsel %vm733_vm8, %v1420_v63, 0.0  ;;  %v1529_v4 = vsel %vm985_vm10, %v1305_v42, 0.0  ;;  %v1306_v62 = vmul.f32 %v2383_v5, %v2967_v7  ;;  %v1510_v46 = vsel %vm733_vm8, %v1494_v8, 0.0 }
 0x617   :  { %1536 = vadd.xlane.f32.xlu1 %v1535_v32  ;;  %v1417_v24 = vsel %vm726_vm6, %v1304_v55, 0.0  ;;  %v1454_v29 = vsel %vm817_vm5, %v1304_v55, 0.0  ;;  %v1491_v60 = vsel %vm901_vm9, %v1304_v55, 0.0  ;;  %v1528_v2 = vsel %vm985_vm10, %v1304_v55, 0.0 }
 0x618   :  { %v1427_v57 = vsel %vm733_vm8, %v1417_v24, 0.0  ;;  %v1464_v59 = vsel %vm733_vm8, %v1454_v29, 0.0  ;;  %v1501_v61 = vsel %vm733_vm8, %v1491_v60, 0.0  ;;  %v1538_v3 = vsel %vm733_vm8, %v1528_v2, 0.0 }
 0x619   :  { %v1541_v6 = vsel %vm733_vm8, %v1529_v4, 0.0  ;;  %v1419_v11 = vsel %vm726_vm6, %v1306_v62, 0.0  ;;  %v1456_v14 = vsel %vm817_vm5, %v1306_v62, 0.0  ;;  %v1493_v7 = vsel %vm901_vm9, %v1306_v62, 0.0 }
 0x61a   :  { %v1433_v12 = vsel %vm733_vm8, %v1419_v11, 0.0  ;;  %v1470_v36 = vsel %vm733_vm8, %v1456_v14, 0.0  ;;  %v1507_v17 = vsel %vm733_vm8, %v1493_v7, 0.0  ;;  %v1530_v47 = vsel %vm985_vm10, %v1306_v62, 0.0 }
 0x61b   :  { %1422 = vadd.xlane.f32.xlu1 %v1421_v34  ;;  %v1544_v13 = vsel %vm733_vm8, %v1530_v47, 0.0  ;;  %v1531_v48 = vsel %vm985_vm10, %v2997_v21, 0.0  ;;  %vm1476_vm3 = vcmp.eq.s32.totalorder %v3084_v22, 1  ;;  %vm1439_vm5 = vcmp.eq.s32.totalorder %v3084_v22, 0 }
 0x61c   :  { %v1547_v50 = vsel %vm733_vm8, %v1531_v48, 0.0  ;;  %vm1513_vm6 = vcmp.eq.s32.totalorder %v3084_v22, 2  ;;  %vm1550_vm8 = vcmp.eq.s32.totalorder %v3084_v22, 3  ;;  %v1646_v22 = vld [vmem:[%s3231_s11 + $0x10] sm:$0xff] }
 0x61f   :  { %1459 = vadd.xlane.f32.xlu1 %v1458_v37 }
 0x623   :  { %1496 = vadd.xlane.f32.xlu1 %v1495_v39 }
 0x627   :  { %1533 = vadd.xlane.f32.xlu1 %v1532_v43 }
 0x62b   :  { %1431 = vadd.xlane.f32.xlu1 %v1430_v52 }
 0x62f   :  { %1468 = vadd.xlane.f32.xlu1 %v1467_v49 }
 0x633   :  { %1505 = vadd.xlane.f32.xlu1 %v1504_v56 }
 0x637   :  { %1428 = vadd.xlane.f32.xlu1 %v1427_v57 }
 0x63b   :  { %1465 = vadd.xlane.f32.xlu1 %v1464_v59 }
 0x63f   :  { %1502 = vadd.xlane.f32.xlu1 %v1501_v61 }
 0x643   :  { %1437 = vadd.xlane.f32.xlu1 %v1436_v0 }
 0x647   :  { %1539 = vadd.xlane.f32.xlu1 %v1538_v3 }
 0x64b   :  { %1542 = vadd.xlane.f32.xlu1 %v1541_v6 }
 0x64f   :  { %1511 = vadd.xlane.f32.xlu1 %v1510_v46 }
 0x653   :  { %1434 = vadd.xlane.f32.xlu1 %v1433_v12 }
 0x657   :  { %1471 = vadd.xlane.f32.xlu1 %v1470_v36 }
 0x65b   :  { %1508 = vadd.xlane.f32.xlu1 %v1507_v17 }
 0x65f   :  { %1545 = vadd.xlane.f32.xlu1 %v1544_v13 }
 0x663   :  { %1548 = vadd.xlane.f32.xlu1 %v1547_v50 }
 0x698   :  { %v1426_v53 = vpop.xlane.xlu1 %1425 }
 0x699   :  { %v1441_v26 = vsel %vm1439_vm5, %v1426_v53, 0.0 }
 0x69c   :  { %v1463_v18 = vpop.xlane.xlu1 %1462 }
 0x69d   :  { %v1478_v25 = vsel %vm1476_vm3, %v1463_v18, 0.0 }
 0x69e   :  { %v1484_v30 = vadd.f32 %v1478_v25, %v1441_v26 }
 0x6a0   :  { %v1500_v19 = vpop.xlane.xlu1 %1499  ;;  %v1475_v48 = vpop.xlane.xlu0 %1474 }
 0x6a1   :  { %v1515_v1 = vsel %vm1513_vm6, %v1500_v19, 0.0  ;;  %v1482_v19 = vsel %vm1476_vm3, %v1475_v48, 0.0 }
 0x6a2   :  { %v1521_v37 = vadd.f32 %v1515_v1, %v1484_v30 }
 0x6a4   :  { %v1537_v20 = vpop.xlane.xlu1 %1536 }
 0x6a5   :  { %v1552_v33 = vsel %vm1550_vm8, %v1537_v20, 0.0 }
 0x6a6   :  { %v1558_v31 = vadd.f32 %v1552_v33, %v1521_v37  ;;  %v1644_v33 = vld [vmem:[%s3231_s11] sm:$0xff] }
 0x6a8   :  { %v1423_v23 = vpop.xlane.xlu1 %1422  ;;  %v1564_v45 = vmul.f32 %v3021_v44, %v1558_v31 }
 0x6a9   :  { %v1440_v34 = vsel %vm1439_vm5, %v1423_v23, 0.0 }
 0x6ac   :  { %v1460_v21 = vpop.xlane.xlu1 %1459 }
 0x6ad   :  { %v1477_v28 = vsel %vm1476_vm3, %v1460_v21, 0.0 }
 0x6ae   :  { %v1483_v38 = vadd.f32 %v1477_v28, %v1440_v34  ;;  %v1645_v34 = vld [vmem:[%s3231_s11 + $0x8] sm:$0xff] }
 0x6af   :  { %v2312_v31 = vpack.c.bf16 %v1645_v34, %v1644_v33 }
 0x6b0   :  { %v1497_v32 = vpop.xlane.xlu1 %1496 }
 0x6b1   :  { %v1514_v35 = vsel %vm1513_vm6, %v1497_v32, 0.0 }
 0x6b2   :  { %v1520_v39 = vadd.f32 %v1514_v35, %v1483_v38 }
 0x6b4   :  { %v1534_v41 = vpop.xlane.xlu1 %1533 }
 0x6b5   :  { %v1551_v42 = vsel %vm1550_vm8, %v1534_v41, 0.0 }
 0x6b6   :  { %v1557_v43 = vadd.f32 %v1551_v42, %v1520_v39  ;;  %v1647_v39 = vld [vmem:[%s3231_s11 + $0x18] sm:$0xff]  ;;  %v1808_v42 = vld [vmem:[%s3233_s13] sm:$0xff] }
 0x6b7   :  { %v2316_v41 = vpack.c.bf16 %v1647_v39, %v1646_v22 }
 0x6b8   :  { %v1563_v52 = vmul.f32 %v1557_v43, %v3036_v58  ;;  %v1432_v54 = vpop.xlane.xlu1 %1431  ;;  %v1809_v43 = vld [vmem:[%s3233_s13 + $0x8] sm:$0xff] }
 0x6b9   :  { %v1443_v63 = vsel %vm1439_vm5, %v1432_v54, 0.0 }
 0x6ba   :  { %v2300_v40 = vpack.c.bf16 %v1564_v45, %v1563_v52  ;;  %v2320_v45 = vpack.c.bf16 %v1809_v43, %v1808_v42  ;;  %v1811_v52 = vld [vmem:[%s3233_s13 + $0x18] sm:$0xff] }
 0x6bc   :  { %2301 = vmatprep.subr.bf16.mxu0 %v2300_v40  ;;  %v1469_v49 = vpop.xlane.xlu1 %1468  ;;  %2321 = vmatprep.subr.bf16.mxu1 %v2320_v45 }
 0x6bd   :  { %2303 = vmatpush3.bf16.msra.mxu0 %v2300_v40  ;;  %v1480_v59 = vsel %vm1476_vm3, %v1469_v49, 0.0  ;;  %2323 = vmatpush3.bf16.msra.mxu1 %v2320_v45  ;;  %v1812_v40 = vld [vmem:[%s3233_s13 + $0x20] sm:$0xff]  ;;  %v1813_v49 = vld [vmem:[%s3233_s13 + $0x28] sm:$0xff] }
 0x6be   :  { %v1486_v3 = vadd.f32 %v1480_v59, %v1443_v63 }
 0x6c0   :  { %v1506_v27 = vpop.xlane.xlu1 %1505 }
 0x6c1   :  { %v1517_v0 = vsel %vm1513_vm6, %v1506_v27, 0.0  ;;  %v2328_v27 = vpack.c.bf16 %v1813_v49, %v1812_v40 }
 0x6c2   :  { %v1523_v5 = vadd.f32 %v1517_v0, %v1486_v3 }
 0x6c4   :  { %v1429_v55 = vpop.xlane.xlu1 %1428 }
 0x6c5   :  { %v1442_v44 = vsel %vm1439_vm5, %v1429_v55, 0.0  ;;  %v1814_v55 = vld [vmem:[%s3233_s13 + $0x30] sm:$0xff] }
 0x6c8   :  { %v1466_v56 = vpop.xlane.xlu1 %1465 }
 0x6c9   :  { %v1479_v29 = vsel %vm1476_vm3, %v1466_v56, 0.0  ;;  %v1815_v56 = vld [vmem:[%s3233_s13 + $0x38] sm:$0xff] }
 0x6ca   :  { %v1485_v60 = vadd.f32 %v1479_v29, %v1442_v44 }
 0x6cc   :  { %v1503_v24 = vpop.xlane.xlu1 %1502 }
 0x6cd   :  { %v1516_v58 = vsel %vm1513_vm6, %v1503_v24, 0.0  ;;  %v2332_v24 = vpack.c.bf16 %v1815_v56, %v1814_v55 }
 0x6ce   :  { %v1522_v4 = vadd.f32 %v1516_v58, %v1485_v60 }
 0x6d0   :  { %v1438_v57 = vpop.xlane.xlu1 %1437 }
 0x6d1   :  { %v1445_v50 = vsel %vm1439_vm5, %v1438_v57, 0.0  ;;  %v1967_v57 = vld [vmem:[%s3232_s12] ss:$0 sm:$0xff] }
 0x6d2   :  { %v1488_v21 = vadd.f32 %v1482_v19, %v1445_v50 }
 0x6d4   :  { %v1540_v61 = vpop.xlane.xlu1 %1539 }
 0x6d5   :  { %v1553_v2 = vsel %vm1550_vm8, %v1540_v61, 0.0 }
 0x6d6   :  { %v1559_v6 = vadd.f32 %v1553_v2, %v1522_v4 }
 0x6d8   :  { %v1543_v8 = vpop.xlane.xlu1 %1542  ;;  %v1565_v11 = vmul.f32 %v1559_v6, %v3069_v16 }
 0x6d9   :  { %v1554_v62 = vsel %vm1550_vm8, %v1543_v8, 0.0 }
 0x6da   :  { %v1560_v46 = vadd.f32 %v1554_v62, %v1523_v5 }
 0x6dc   :  { %v1566_v12 = vmul.f32 %v3065_v15, %v1560_v46  ;;  %v1512_v14 = vpop.xlane.xlu1 %1511 }
 0x6dd   :  { %v1519_v20 = vsel %vm1513_vm6, %v1512_v14, 0.0 }
 0x6de   :  { %v2304_v36 = vpack.c.bf16 %v1566_v12, %v1565_v11  ;;  %v1525_v26 = vadd.f32 %v1519_v20, %v1488_v21 }
 0x6e0   :  { %2305 = vmatprep.subr.bf16.mxu0 %v2304_v36  ;;  %v1435_v7 = vpop.xlane.xlu1 %1434 }
 0x6e1   :  { %2307 = vmatpush3.bf16.msra.mxu0 %v2304_v36  ;;  %v1444_v53 = vsel %vm1439_vm5, %v1435_v7, 0.0 }
 0x6e4   :  { %v1472_v17 = vpop.xlane.xlu1 %1471 }
 0x6e5   :  { %v1481_v13 = vsel %vm1476_vm3, %v1472_v17, 0.0 }
 0x6e6   :  { %v1487_v16 = vadd.f32 %v1481_v13, %v1444_v53 }
 0x6e8   :  { %v1509_v47 = vpop.xlane.xlu1 %1508 }
 0x6e9   :  { %v1518_v15 = vsel %vm1513_vm6, %v1509_v47, 0.0 }
 0x6ea   :  { %v1524_v25 = vadd.f32 %v1518_v15, %v1487_v16 }
 0x6ec   :  { %v1546_v18 = vpop.xlane.xlu1 %1545 }
 0x6ed   :  { %v1555_v23 = vsel %vm1550_vm8, %v1546_v18, 0.0 }
 0x6ee   :  { %v1561_v1 = vadd.f32 %v1555_v23, %v1524_v25 }
 0x6f0   :  { %v1549_v28 = vpop.xlane.xlu1 %1548  ;;  %v1567_v35 = vmul.f32 %v1561_v1, %v3081_v10 }
 0x6f1   :  { %v1556_v30 = vsel %vm1550_vm8, %v1549_v28, 0.0 }
 0x6f2   :  { %v1562_v32 = vadd.f32 %v1556_v30, %v1525_v26 }
 0x6f4   :  { %v1568_v37 = vmul.f32 %v3079_v51, %v1562_v32 }
 0x6f6   :  { %v2308_v38 = vpack.c.bf16 %v1568_v37, %v1567_v35 }
 0x6f8   :  { %2309 = vmatprep.subr.bf16.mxu0 %v2308_v38 }
 0x6f9   :  { %2311 = vmatpush3.bf16.msra.mxu0 %v2308_v38 }
 0x6fa   :  { %2313 = vmatprep.subr.bf16.mxu0 %v2312_v31 }
 0x6fc   :  { %2216 = vmatmul.mubr.msk.f32.vlgmr.msra.gmra.mrb[14].mxu0 %vm1119_vm12, %v2971_v9  ;;  %v1810_v9 = vld [vmem:[%s3233_s13 + $0x10] sm:$0xff] }
 0x6fd   :  { %2315 = vmatpush3.bf16.msra.mxu0 %v2312_v31  ;;  %v2324_v54 = vpack.c.bf16 %v1811_v52, %v1810_v9 }
 0x6fe   :  { %2317 = vmatprep.subr.bf16.mxu0 %v2316_v41 }
 0x6ff   :  { %2325 = vmatprep.subr.bf16.mxu1 %v2324_v54 }
 0x700   :  { %2327 = vmatpush3.bf16.msra.mxu1 %v2324_v54 }
 0x701   :  { %2319 = vmatpush3.bf16.msra.mxu0 %v2316_v41  ;;  %2329 = vmatprep.subr.bf16.mxu1 %v2328_v27 }
 0x704   :  { %2331 = vmatpush3.bf16.msra.mxu1 %v2328_v27 }
 0x705   :  { %2333 = vmatprep.subr.bf16.mxu1 %v2332_v24 }
 0x708   :  { %2335 = vmatpush3.bf16.msra.mxu1 %v2332_v24 }
 0x7cf   :  { %v2217_v51 = vpop.f32.mrb[14].mxu0 }
 0x7d0   :  { %v1635_v10 = vpop.f32.mrb[15].mxu0 }
 0x7d1   :  { %2226 = vmatprep.mubr.msk.f32.mxu0 %vm88_vm0, %v1635_v10 }
 0x7d2   :  { %2227 = vmatmul.mubr.msk.f32.vlgmr.msra.gmra.mrb[16].mxu0 %vm88_vm0, %v2217_v51 }
 0x8a5   :  { %v2228_v29 = vpop.f32.mrb[16].mxu0 }
 0x8a6   :  { %v3187_v59 = vadd.f32 %v2228_v29, %v1967_v57  ;;  %v1727_v44 = vpop.f32.mrb[17].mxu0 }
 0x8a7   :  { %v3189_v58 = vadd.f32 %v1967_v57, %v1727_v44 }
 0x8a8   :  { %v3192_v60 = vmul.f32 0.70710677, %v3187_v59 }
 0x8a9   :  { %v3195_v61 = vmul.f32 0.70710677, %v3189_v58 }
 0x8aa   :  { %v1741_v63 = vand.u32 2147483647, %v3192_v60  ;;  %vm1797_vm9 = vcmp.ge.f32.partialorder %v3192_v60, 0.0  ;;  %v1972_v60 = vld [vmem:[%s3234_s14] ss:$0 sm:$0xff] }
 0x8ab   :  { %v1740_v0 = vand.u32 2147483647, %v3195_v61  ;;  %vm1796_vm10 = vcmp.ge.f32.partialorder %v3195_v61, 0.0 }
 0x8ac   :  { %v1743_v2 = vmul.f32 0.5, %v1741_v63  ;;  %v1785_v31 = vsub.f32 0.0, %v1741_v63 }
 0x8ad   :  { %v1742_v3 = vmul.f32 0.5, %v1740_v0  ;;  %v1784_v39 = vsub.f32 0.0, %v1740_v0 }
 0x8ae   :  { %v1745_v4 = vadd.f32 1.0, %v1743_v2  ;;  %v1787_v42 = vmul.f32 %v1785_v31, %v1741_v63  ;;  %v1737_v63 = vmul.f32 0.5, %v3187_v59 }
 0x8af   :  { %v1744_v5 = vadd.f32 1.0, %v1742_v3  ;;  %v1786_v45 = vmul.f32 %v1784_v39, %v1740_v0 }
 0x8b0   :  { %2384 = vrcp.f32 %v1745_v4  ;;  %v1736_v4 = vmul.f32 0.5, %v3189_v58 }
 0x8b1   :  { %2386 = vrcp.f32 %v1744_v5 }
 0x8ba   :  { %v2385_v6 = vpop.eup %2384 }
 0x8bb   :  { %v2387_v8 = vpop.eup %2386  ;;  %v1749_v62 = vmul.f32 0.17087276, %v2385_v6 }
 0x8bc   :  { %v1748_v46 = vmul.f32 0.17087276, %v2387_v8 }
 0x8bd   :  { %v1751_v11 = vadd.f32 -0.82215226, %v1749_v62 }
 0x8be   :  { %v1750_v12 = vadd.f32 -0.82215226, %v1748_v46 }
 0x8bf   :  { %v1753_v14 = vmul.f32 %v2385_v6, %v1751_v11 }
 0x8c0   :  { %v1752_v36 = vmul.f32 %v2387_v8, %v1750_v12 }
 0x8c1   :  { %v1755_v7 = vadd.f32 1.4885159, %v1753_v14 }
 0x8c2   :  { %v1754_v17 = vadd.f32 1.4885159, %v1752_v36 }
 0x8c3   :  { %v1757_v47 = vmul.f32 %v2385_v6, %v1755_v7 }
 0x8c4   :  { %v1756_v13 = vmul.f32 %v2387_v8, %v1754_v17 }
 0x8c5   :  { %v1759_v48 = vadd.f32 -1.135204, %v1757_v47 }
 0x8c6   :  { %v1758_v50 = vadd.f32 -1.135204, %v1756_v13 }
 0x8c7   :  { %v1761_v53 = vmul.f32 %v2385_v6, %v1759_v48 }
 0x8c8   :  { %v1760_v15 = vmul.f32 %v2387_v8, %v1758_v50 }
 0x8c9   :  { %v1763_v16 = vadd.f32 0.27886808, %v1761_v53 }
 0x8ca   :  { %v1762_v18 = vadd.f32 0.27886808, %v1760_v15 }
 0x8cb   :  { %v1765_v19 = vmul.f32 %v2385_v6, %v1763_v16 }
 0x8cc   :  { %v1764_v20 = vmul.f32 %v2387_v8, %v1762_v18 }
 0x8cd   :  { %v1767_v23 = vadd.f32 -0.18628806, %v1765_v19 }
 0x8ce   :  { %v1766_v21 = vadd.f32 -0.18628806, %v1764_v20 }
 0x8cf   :  { %v1769_v25 = vmul.f32 %v2385_v6, %v1767_v23 }
 0x8d0   :  { %v1768_v26 = vmul.f32 %v2387_v8, %v1766_v21 }
 0x8d1   :  { %v1771_v1 = vadd.f32 0.09678418, %v1769_v25 }
 0x8d2   :  { %v1770_v28 = vadd.f32 0.09678418, %v1768_v26 }
 0x8d3   :  { %v1773_v30 = vmul.f32 %v2385_v6, %v1771_v1 }
 0x8d4   :  { %v1772_v32 = vmul.f32 %v2387_v8, %v1770_v28 }
 0x8d5   :  { %v1775_v33 = vadd.f32 0.37409195, %v1773_v30 }
 0x8d6   :  { %v1774_v34 = vadd.f32 0.37409195, %v1772_v32 }
 0x8d7   :  { %v1777_v35 = vmul.f32 %v2385_v6, %v1775_v33 }
 0x8d8   :  { %v1776_v37 = vmul.f32 %v2387_v8, %v1774_v34 }
 0x8d9   :  { %v1779_v38 = vadd.f32 1.0000237, %v1777_v35 }
 0x8da   :  { %v1778_v22 = vadd.f32 1.0000237, %v1776_v37 }
 0x8db   :  { %v1781_v41 = vmul.f32 %v2385_v6, %v1779_v38 }
 0x8dc   :  { %v1780_v51 = vmul.f32 %v2387_v8, %v1778_v22 }
 0x8dd   :  { %v1783_v10 = vadd.f32 -1.2655122, %v1781_v41 }
 0x8de   :  { %v1782_v43 = vadd.f32 -1.2655122, %v1780_v51 }
 0x8df   :  { %v1789_v9 = vadd.f32 %v1787_v42, %v1783_v10 }
 0x8e0   :  { %v1788_v52 = vadd.f32 %v1786_v45, %v1782_v43 }
 0x8e1   :  { %v1792_v54 = vmul.f32 1.442695, %v1789_v9 }
 0x8e2   :  { %v1790_v40 = vmul.f32 1.442695, %v1788_v52 }
 0x8e3   :  { %2388 = vpow2.f32 %v1792_v54 }
 0x8e4   :  { %2390 = vpow2.f32 %v1790_v40 }
 0x8ed   :  { %v2389_v49 = vpop.eup %2388 }
 0x8ee   :  { %v2391_v27 = vpop.eup %2390  ;;  %v1795_v55 = vmul.f32 %v2389_v49, %v2385_v6 }
 0x8ef   :  { %v1794_v56 = vmul.f32 %v2391_v27, %v2387_v8 }
 0x8f0   :  { %v1799_v24 = vsub.f32 1.0, %v1795_v55  ;;  %v1971_v57 = vadd.f32 -1.0, %v1795_v55 }
 0x8f1   :  { %v1798_v29 = vsub.f32 1.0, %v1794_v56  ;;  %v1970_v44 = vadd.f32 -1.0, %v1794_v56 }
 0x8f2   :  { %v1803_v2 = vsel %vm1797_vm9, %v1799_v24, %v1971_v57 }
 0x8f3   :  { %v1805_v0 = vadd.f32 1.0, %v1803_v2  ;;  %v1802_v3 = vsel %vm1796_vm10, %v1798_v29, %v1970_v44 }
 0x8f4   :  { %v1804_v5 = vadd.f32 1.0, %v1802_v3 }
 0x8f5   :  { %v1807_v62 = vmul.f32 %v1805_v0, %v1737_v63 }
 0x8f6   :  { %v1806_v6 = vmul.f32 %v1804_v5, %v1736_v4 }
 0x8f8   :  { %2245 = vmatprep.mubr.msk.f32.mxu1 %vm1823_vm13, %v1806_v6 }
 0x8f9   :  { %2246 = vmatmul.mubr.msk.f32.vlgmr.msra.gmra.mrb[14].mxu1 %vm1823_vm13, %v1807_v62 }
 0x9cc   :  { %v2247_v8 = vpop.f32.mrb[14].mxu1 }
 0x9cd   :  { %v1902_v61 = vadd.f32 %v2247_v8, %v1972_v60  ;;  %v1896_v46 = vpop.f32.mrb[15].mxu1 }
 0x9ce   :  { %v1897_v59 = vadd.f32 %v1972_v60, %v1896_v46 }
 0x9cf   :  { %1906 = vst.msk [vmem:[#allocation2 + $0x8] sm:$0xff] %vm88_vm0, %v1902_v61 }
 0x9d0   :  { %1905 = vst.msk [vmem:[#allocation2] sm:$0xff] %vm88_vm0, %v1897_v59 }
 0x9d1   :  { %2403 = shalt.err (!%p2400_p4)
}
 0x9d2   :  { %s2404_s20 = scalar_lea.hbm %s3235_s15, 256 }
 0x9d3   :  { %p2405_p5 = scmp.ne.s32.totalorder %s3235_s15, %s2404_s20  ;;  %p2408_p6 = scmp.lt.u32.totalorder %s2404_s20, %s3235_s15 }
 0x9d5   :  { %p2410_p7 = pnand %p2408_p6, %p2405_p5 }
 0x9d7   :  { %2413 = shalt.err (!%p2410_p7)
}
 0x9d8   :  { %s2417_s6 = smov 128   ;;  %s2418_s25 = smov 8  }
 0x9d9   :  { %1918 = dma.vmem_to_hbm [thread:$0]  %s1913_s10, 256, %s3235_s15, [#allocation3], %s2417_s6, %s2417_s6, %s2418_s25  }
 0x9da   :  { %2414 = dma.done.wait [#allocation3], 256  }
 0x9db   :  { %2415 = vsyncadd [#allocation3], 4294967040 }
 0x9dc   :  { %1922 = vsyncpa [#allocation3], 1 }

</bundles_post_ra>
